<compile_context>
chip_gen: v6e
topology: v6e:2x2x1
jax: 0.10.0
libtpu: 0.0.40
codegen_flags: <defaults>
</compile_context>

<pallas_src>
import functools
import numpy as np
import jax
import jax.numpy as jnp
from jax import lax
from jax.experimental import pallas as pl
from jax.experimental.pallas import tpu as pltpu


def _interp_matrix(out_size, in_size):
    """PyTorch bilinear align_corners=True 1-D interpolation matrix (out, in)."""
    A = np.zeros((out_size, in_size), dtype=np.float64)
    if out_size == 1:
        coords = np.zeros((1,))
    else:
        coords = np.arange(out_size) * (in_size - 1) / (out_size - 1)
    for i, s in enumerate(coords):
        i0 = min(int(np.floor(s)), in_size - 1)
        i1 = min(i0 + 1, in_size - 1)
        w1 = s - i0
        A[i, i0] += 1.0 - w1
        A[i, i1] += w1
    return A


def _tap_masks(H, W):
    """(9, H*W) 0/1 masks: mask[t, p] == 1 iff 3x3 tap t stays inside the image."""
    m = np.ones((9, H, W), dtype=np.float32)
    for t in range(9):
        dy, dx = t // 3 - 1, t % 3 - 1
        if dy < 0:
            m[t, :(-dy), :] = 0.0
        if dy > 0:
            m[t, H - dy:, :] = 0.0
        if dx < 0:
            m[t, :, :(-dx)] = 0.0
        if dx > 0:
            m[t, :, W - dx:] = 0.0
    return m.reshape(9, H * W)


def _edge_kernel(aspp_ref, l1_ref, mt_ref, w_ref, bias_ref, mask_ref,
                 edge_ref, body_ref, x_ref, *, H, W, Ca, Cs, nb):
    HW = H * W
    L = nb * HW
    Ctot = Ca + Cs
    P = W + 1                 # max |flattened 3x3 tap shift|  (dy*W + dx)

    # Zero the staging pad margins so masked taps never touch NaN/Inf garbage.
    zpad = jnp.zeros((Ctot, P), jnp.bfloat16)
    x_ref[:, 0:P] = zpad
    x_ref[:, P + L:2 * P + L] = zpad

    # ---- bilinear upsample (align_corners=True): one batched lane-dense matmul
    # (nb*Ca, Ha*Wa) @ (Ha*Wa, HW) -> (nb*Ca, HW), f32.
    up = jnp.dot(aspp_ref[...], mt_ref[...],
                 preferred_element_type=jnp.float32)

    # ---- write `up` out now (it is seg_body before the subtraction) and stage
    # the bf16 conv input x = [up ; layer1] channel-major with the batch
    # stacked along lanes: x[:, b*HW + p].
    for b in range(nb):
        ub = up[b * Ca:(b + 1) * Ca, :]
        body_ref[b] = ub
        x_ref[0:Ca, P + b * HW:P + (b + 1) * HW] = ub.astype(jnp.bfloat16)
        x_ref[Ca:Ctot, P + b * HW:P + (b + 1) * HW] = l1_ref[b].astype(jnp.bfloat16)

    # ---- grouped 3x3 conv (BN scale folded into w) as 9 accumulated matmuls --
    # tap t = (dy+1)*3 + (dx+1): neighbour offset off = dy*W + dx is a static
    # lane shift of the staged input; out-of-image taps are zeroed by mask[t].
    acc = jnp.dot(w_ref[4], x_ref[:, P:P + L],
                  preferred_element_type=jnp.float32)        # centre tap, no mask
    for t in range(9):
        if t == 4:
            continue
        dy, dx = t // 3 - 1, t % 3 - 1
        off = dy * W + dx
        xt = x_ref[:, P + off:P + off + L] * mask_ref[t:t + 1, :]
        acc = acc + jnp.dot(w_ref[t], xt, preferred_element_type=jnp.float32)

    # ---- bias (folded BN shift) + ReLU, then the two outputs -----------------
    edge = jnp.maximum(acc + bias_ref[...], 0.0)             # (Cout, nb*HW) f32
    for b in range(nb):
        eb = edge[:, b * HW:(b + 1) * HW]
        edge_ref[b] = eb
        body_ref[b] = body_ref[b] - eb


class EdgeExtractorWofirstextPallas:
    def __init__(self, inplane, skip_num, key, groups=8, eps=1e-5):
        self.inplane = inplane
        self.skip_num = skip_num
        self.groups = groups
        ctot = inplane + skip_num
        assert inplane % groups == 0 and ctot % groups == 0

        kw, kg, kb, km, kv = jax.random.split(key, 5)
        # extractor conv weight: (Cout, Ctot // groups, 3, 3), bias=False
        self.w_grouped = jax.random.normal(
            kw, (inplane, ctot // groups, 3, 3), jnp.float32) * 0.1
        # BatchNorm(inplane) parameters / running statistics (inference mode)
        gamma = 1.0 + 0.1 * jax.random.normal(kg, (inplane,), jnp.float32)
        beta = 0.1 * jax.random.normal(kb, (inplane,), jnp.float32)
        rmean = 0.1 * jax.random.normal(km, (inplane,), jnp.float32)
        rvar = 1.0 + 0.1 * jax.random.uniform(kv, (inplane,), jnp.float32)
        self.scale = gamma / jnp.sqrt(rvar + eps)
        self.bias = beta - rmean * self.scale

        # Densify the grouped weight -> (Cout, Ctot, 3, 3) (zeros off the group
        # diagonal), fold the BN scale into the output rows, reorder to the
        # per-tap (9, Cout, Ctot) layout used by the accumulated conv matmuls.
        # TODO(synk): exploit the block-diagonal grouped structure (8x fewer
        #             MACs) once Cout/groups is large enough to fill the MXU.
        og, ig = inplane // groups, ctot // groups
        wd = np.zeros((inplane, ctot, 3, 3), dtype=np.float32)
        w_np = np.asarray(self.w_grouped)
        for g in range(groups):
            wd[g * og:(g + 1) * og, g * ig:(g + 1) * ig] = w_np[g * og:(g + 1) * og]
        wd = wd * np.asarray(self.scale)[:, None, None, None]
        self.w_taps = jnp.asarray(
            np.transpose(wd, (2, 3, 0, 1)).reshape(9, inplane, ctot), jnp.bfloat16)
        self.bias_col = jnp.asarray(
            np.asarray(self.bias).reshape(inplane, 1), dtype=jnp.float32)
        self._mt_cache = {}
        self._mask_cache = {}

    def _interp_mt(self, H, W, Ha, Wa):
        key = (H, W, Ha, Wa)
        if key not in self._mt_cache:
            # TODO(synk): separable (A_w then A_h) form for production sizes;
            #             this dense kron matrix scales as Ha*Wa*H*W.
            mt = np.kron(_interp_matrix(H, Ha), _interp_matrix(W, Wa)).T
            self._mt_cache[key] = jnp.asarray(mt, dtype=jnp.float32)
        return self._mt_cache[key]

    def _masks(self, H, W, nb):
        key = (H, W, nb)
        if key not in self._mask_cache:
            m = np.tile(_tap_masks(H, W), (1, nb))
            self._mask_cache[key] = jnp.asarray(m, dtype=jnp.bfloat16)
        return self._mask_cache[key]

    @staticmethod
    def _pick_nb(N, Ca, Cs, Cout, HaWa, HW, W, budget_bytes=40 * 1024 * 1024):
        """Largest images-per-step fitting an explicit VMEM budget (v7x-safe)
        while keeping >= 2 grid steps for megacore / pipelining overlap."""
        Ctot = Ca + Cs
        best = 1
        for nb in range(1, N + 1):
            if N % nb or (N > 1 and N // nb < 2):
                continue
            L = nb * HW
            est = (2 * nb * Ca * HaWa * 4          # aspp blocks (double-buffered)
                   + 2 * nb * Cs * HW * 4          # layer1 blocks (double-buffered)
                   + HaWa * HW * 4                 # interp matrix (single-buffered)
                   + 9 * Cout * Ctot * 2           # conv tap weights
                   + Cout * 4 + 9 * L * 2          # bias + tap masks
                   + 2 * 2 * nb * Cout * HW * 4    # two f32 outputs (double-buffered)
                   + Ctot * (L + 2 * (W + 1)) * 2  # bf16 staging scratch
                   + 4 * Cout * L * 4)             # up / acc / edge working values
            if est <= budget_bytes:
                best = nb
        return best

    def __call__(self, aspp, layer1):
        # aspp:   (N, inplane, Ha, Wa)   NCHW, f32
        # layer1: (N, skip_num, H, W)    NCHW, f32
        N, Ca, Ha, Wa = aspp.shape
        N2, Cs, H, W = layer1.shape
        assert N == N2 and Ca == self.inplane and Cs == self.skip_num
        Cout, Ctot = self.inplane, Ca + Cs
        HW, HaWa = H * W, Ha * Wa

        nb = self._pick_nb(N, Ca, Cs, Cout, HaWa, HW, W)
        L = nb * HW

        mt = self._interp_mt(H, W, Ha, Wa)           # (HaWa, HW) f32
        masks = self._masks(H, W, nb)                # (9, nb*HW) bf16 0/1

        # Free reshapes only (no transposes, no wrapper dtype casts).
        aspp_r = aspp.reshape(N * Ca, HaWa)
        l1_r = layer1.reshape(N, Cs, HW)

        kernel = functools.partial(_edge_kernel, H=H, W=W, Ca=Ca, Cs=Cs, nb=nb)
        const = pl.Buffered(1)                       # single-buffer grid-invariants

        grid_spec = pltpu.PrefetchScalarGridSpec(
            num_scalar_prefetch=0,
            grid=(N // nb,),
            in_specs=[
                pl.BlockSpec((nb * Ca, HaWa), lambda i: (i, 0)),
                pl.BlockSpec((nb, Cs, HW), lambda i: (i, 0, 0)),
                pl.BlockSpec((HaWa, HW), lambda i: (0, 0), pipeline_mode=const),
                pl.BlockSpec((9, Cout, Ctot), lambda i: (0, 0, 0), pipeline_mode=const),
                pl.BlockSpec((Cout, 1), lambda i: (0, 0), pipeline_mode=const),
                pl.BlockSpec((9, L), lambda i: (0, 0), pipeline_mode=const),
            ],
            out_specs=[
                pl.BlockSpec((nb, Cout, HW), lambda i: (i, 0, 0)),
                pl.BlockSpec((nb, Cout, HW), lambda i: (i, 0, 0)),
            ],
            scratch_shapes=[
                pltpu.VMEM((Ctot, L + 2 * (W + 1)), jnp.bfloat16),  # padded x staging
            ],
        )

        edge_f, body_f = pl.pallas_call(
            kernel,
            out_shape=(jax.ShapeDtypeStruct((N, Cout, HW), jnp.float32),
                       jax.ShapeDtypeStruct((N, Cout, HW), jnp.float32)),
            grid_spec=grid_spec,
            compiler_params=pltpu.CompilerParams(
                dimension_semantics=("parallel",),
                vmem_limit_bytes=64 * 1024 * 1024),
        )(aspp_r, l1_r, mt, self.w_taps, self.bias_col, masks)

        # (N, Cout, H*W) -> NCHW is a free reshape.
        return (edge_f.reshape(N, Cout, H, W),
                body_f.reshape(N, Cout, H, W))


def _reference(aspp, layer1, model):
    """Pure-JAX reference (no Pallas) with identical math, f32."""
    N, Ca, Ha, Wa = aspp.shape
    _, Cs, H, W = layer1.shape
    A_h = jnp.asarray(_interp_matrix(H, Ha), jnp.float32)
    A_w = jnp.asarray(_interp_matrix(W, Wa), jnp.float32)
    up = jnp.einsum('hH,ncHW,wW->nchw', A_h, aspp, A_w)
    x = jnp.concatenate([up, layer1], axis=1)
    y = lax.conv_general_dilated(
        x, model.w_grouped, window_strides=(1, 1),
        padding=((1, 1), (1, 1)),
        dimension_numbers=('NCHW', 'OIHW', 'NCHW'),
        feature_group_count=model.groups)
    y = y * model.scale[None, :, None, None] + model.bias[None, :, None, None]
    edge = jnp.maximum(y, 0.0)
    body = up - edge
    return edge, body


if __name__ == "__main__":
    key = jax.random.PRNGKey(0)
    k_aspp, k_l1, k_param = jax.random.split(key, 3)

    N, inplane, skip_num = 2, 16, 16          # inplane and inplane+skip_num % 8 == 0
    Ha, Wa = 8, 8                              # aspp (low-res) spatial
    H, W = 16, 16                              # layer1 (high-res) spatial

    aspp = jax.random.normal(k_aspp, (N, inplane, Ha, Wa), jnp.float32)
    layer1 = jax.random.normal(k_l1, (N, skip_num, H, W), jnp.float32)

    model = EdgeExtractorWofirstextPallas(inplane, skip_num, k_param)
    seg_edge, seg_body = model(aspp, layer1)
    jax.block_until_ready((seg_edge, seg_body))

    assert seg_edge.shape == (N, inplane, H, W)
    assert seg_body.shape == (N, inplane, H, W)

    ref_edge, ref_body = _reference(aspp, layer1, model)
    np.testing.assert_allclose(np.asarray(seg_edge), np.asarray(ref_edge),
                               atol=2e-2, rtol=2e-2)
    np.testing.assert_allclose(np.asarray(seg_body), np.asarray(ref_body),
                               atol=2e-2, rtol=2e-2)

    print("KERNEL_OK")
</pallas_src>

<mosaic_0001>
module attributes {stable_mosaic.version = 11 : i64} {
  func.func @_edge_kernel(%arg0: i32, %arg1: memref<16x64xf32, #tpu.memory_space<vmem>>, %arg2: memref<1x16x256xf32, #tpu.memory_space<vmem>>, %arg3: memref<64x256xf32, #tpu.memory_space<vmem>>, %arg4: memref<9x16x32xbf16, #tpu.memory_space<vmem>>, %arg5: memref<16x1xf32, #tpu.memory_space<vmem>>, %arg6: memref<9x256xbf16, #tpu.memory_space<vmem>>, %arg7: memref<1x16x256xf32, #tpu.memory_space<vmem>>, %arg8: memref<1x16x256xf32, #tpu.memory_space<vmem>>, %arg9: memref<32x290xbf16, #tpu.memory_space<vmem>>) attributes {dimension_semantics = [#tpu.dimension_semantics<parallel>], iteration_bounds = array<i64: 2>, scalar_prefetch = 0 : i64, scratch_operands = 1 : i64, tpu.core_type = #tpu.core_type<tc>, window_params = [{transform_indices = @transform_0, window_bounds = array<i64: 16, 64>}, {transform_indices = @transform_1, window_bounds = array<i64: 1, 16, 256>}, {pipeline_mode = #tpu.pipeline_mode<synchronous>, transform_indices = @transform_2, window_bounds = array<i64: 64, 256>}, {pipeline_mode = #tpu.pipeline_mode<synchronous>, transform_indices = @transform_3, window_bounds = array<i64: 9, 16, 32>}, {pipeline_mode = #tpu.pipeline_mode<synchronous>, transform_indices = @transform_4, window_bounds = array<i64: 16, 1>}, {pipeline_mode = #tpu.pipeline_mode<synchronous>, transform_indices = @transform_5, window_bounds = array<i64: 9, 256>}, {transform_indices = @transform_6, window_bounds = array<i64: 1, 16, 256>}, {transform_indices = @transform_7, window_bounds = array<i64: 1, 16, 256>}]} {
    %cst = arith.constant 0.000000e+00 : bf16
    %0 = vector.broadcast %cst : bf16 to vector<32x17xbf16>
    %c0 = arith.constant 0 : index
    %c0_0 = arith.constant 0 : index
    %1 = vector.load %arg9[%c0, %c0_0] : memref<32x290xbf16, #tpu.memory_space<vmem>>, vector<32x17xbf16>
    tpu.vector_store %arg9[%c0, %c0_0], %0 {strides = array<i32>} : memref<32x290xbf16, #tpu.memory_space<vmem>>, vector<32x17xbf16>,
    %c0_1 = arith.constant 0 : index
    %c273 = arith.constant 273 : index
    %2 = vector.load %arg9[%c0_1, %c273] : memref<32x290xbf16, #tpu.memory_space<vmem>>, vector<32x17xbf16>
    tpu.vector_store %arg9[%c0_1, %c273], %0 {strides = array<i32>} : memref<32x290xbf16, #tpu.memory_space<vmem>>, vector<32x17xbf16>,
    %c0_2 = arith.constant 0 : index
    %c0_3 = arith.constant 0 : index
    %3 = vector.load %arg1[%c0_2, %c0_3] : memref<16x64xf32, #tpu.memory_space<vmem>>, vector<16x64xf32>
    %c0_4 = arith.constant 0 : index
    %c0_5 = arith.constant 0 : index
    %4 = vector.load %arg3[%c0_4, %c0_5] : memref<64x256xf32, #tpu.memory_space<vmem>>, vector<64x256xf32>
    %cst_6 = arith.constant dense<0.000000e+00> : vector<16x256xf32>
    %5 = tpu.matmul %3, %4, %cst_6 {dimension_numbers = #tpu.dot_dimension_numbers<[1], [0], [0], [1], [0, 0, 1, 1], [], []>} : vector<16x64xf32>, vector<64x256xf32>, vector<16x256xf32> -> vector<16x256xf32>
    %c0_7 = arith.constant 0 : index
    %c0_8 = arith.constant 0 : index
    %c0_9 = arith.constant 0 : index
    %6 = vector.load %arg8[%c0_7, %c0_8, %c0_9] : memref<1x16x256xf32, #tpu.memory_space<vmem>>, vector<1x16x256xf32>
    %7 = vector.shape_cast %6 : vector<1x16x256xf32> to vector<16x256xf32>
    %8 = vector.shape_cast %5 : vector<16x256xf32> to vector<1x16x256xf32>
    tpu.vector_store %arg8[%c0_7, %c0_8, %c0_9], %8 {strides = array<i32>} : memref<1x16x256xf32, #tpu.memory_space<vmem>>, vector<1x16x256xf32>,
    %9 = arith.truncf %5 : vector<16x256xf32> to vector<16x256xbf16>
    %c0_10 = arith.constant 0 : index
    %c17 = arith.constant 17 : index
    %10 = vector.load %arg9[%c0_10, %c17] : memref<32x290xbf16, #tpu.memory_space<vmem>>, vector<16x256xbf16>
    tpu.vector_store %arg9[%c0_10, %c17], %9 {strides = array<i32>} : memref<32x290xbf16, #tpu.memory_space<vmem>>, vector<16x256xbf16>,
    %c0_11 = arith.constant 0 : index
    %c0_12 = arith.constant 0 : index
    %c0_13 = arith.constant 0 : index
    %11 = vector.load %arg2[%c0_11, %c0_12, %c0_13] : memref<1x16x256xf32, #tpu.memory_space<vmem>>, vector<1x16x256xf32>
    %12 = vector.shape_cast %11 : vector<1x16x256xf32> to vector<16x256xf32>
    %13 = arith.truncf %12 : vector<16x256xf32> to vector<16x256xbf16>
    %c16 = arith.constant 16 : index
    %c17_14 = arith.constant 17 : index
    %14 = vector.load %arg9[%c16, %c17_14] : memref<32x290xbf16, #tpu.memory_space<vmem>>, vector<16x256xbf16>
    tpu.vector_store %arg9[%c16, %c17_14], %13 {strides = array<i32>} : memref<32x290xbf16, #tpu.memory_space<vmem>>, vector<16x256xbf16>,
    %c4 = arith.constant 4 : index
    %c0_15 = arith.constant 0 : index
    %c0_16 = arith.constant 0 : index
    %15 = vector.load %arg4[%c4, %c0_15, %c0_16] : memref<9x16x32xbf16, #tpu.memory_space<vmem>>, vector<1x16x32xbf16>
    %16 = vector.shape_cast %15 : vector<1x16x32xbf16> to vector<16x32xbf16>
    %c0_17 = arith.constant 0 : index
    %c17_18 = arith.constant 17 : index
    %17 = vector.load %arg9[%c0_17, %c17_18] : memref<32x290xbf16, #tpu.memory_space<vmem>>, vector<32x256xbf16>
    %cst_19 = arith.constant dense<0.000000e+00> : vector<16x256xf32>
    %18 = tpu.matmul %16, %17, %cst_19 {dimension_numbers = #tpu.dot_dimension_numbers<[1], [0], [0], [1], [0, 0, 1, 1], [], []>} : vector<16x32xbf16>, vector<32x256xbf16>, vector<16x256xf32> -> vector<16x256xf32>
    %c0_20 = arith.constant 0 : index
    %c0_21 = arith.constant 0 : index
    %19 = vector.load %arg9[%c0_20, %c0_21] : memref<32x290xbf16, #tpu.memory_space<vmem>>, vector<32x256xbf16>
    %c0_22 = arith.constant 0 : index
    %c0_23 = arith.constant 0 : index
    %20 = vector.load %arg6[%c0_22, %c0_23] : memref<9x256xbf16, #tpu.memory_space<vmem>>, vector<1x256xbf16>
    %21 = vector.broadcast %20 : vector<1x256xbf16> to vector<32x256xbf16>
    %22 = arith.mulf %19, %21 : vector<32x256xbf16>
    %c0_24 = arith.constant 0 : index
    %c0_25 = arith.constant 0 : index
    %c0_26 = arith.constant 0 : index
    %23 = vector.load %arg4[%c0_24, %c0_25, %c0_26] : memref<9x16x32xbf16, #tpu.memory_space<vmem>>, vector<1x16x32xbf16>
    %24 = vector.shape_cast %23 : vector<1x16x32xbf16> to vector<16x32xbf16>
    %cst_27 = arith.constant dense<0.000000e+00> : vector<16x256xf32>
    %25 = tpu.matmul %24, %22, %cst_27 {dimension_numbers = #tpu.dot_dimension_numbers<[1], [0], [0], [1], [0, 0, 1, 1], [], []>} : vector<16x32xbf16>, vector<32x256xbf16>, vector<16x256xf32> -> vector<16x256xf32>
    %26 = arith.addf %18, %25 : vector<16x256xf32>
    %c0_28 = arith.constant 0 : index
    %c1 = arith.constant 1 : index
    %27 = vector.load %arg9[%c0_28, %c1] : memref<32x290xbf16, #tpu.memory_space<vmem>>, vector<32x256xbf16>
    %c1_29 = arith.constant 1 : index
    %c0_30 = arith.constant 0 : index
    %28 = vector.load %arg6[%c1_29, %c0_30] : memref<9x256xbf16, #tpu.memory_space<vmem>>, vector<1x256xbf16>
    %29 = vector.broadcast %28 : vector<1x256xbf16> to vector<32x256xbf16>
    %30 = arith.mulf %27, %29 : vector<32x256xbf16>
    %c1_31 = arith.constant 1 : index
    %c0_32 = arith.constant 0 : index
    %c0_33 = arith.constant 0 : index
    %31 = vector.load %arg4[%c1_31, %c0_32, %c0_33] : memref<9x16x32xbf16, #tpu.memory_space<vmem>>, vector<1x16x32xbf16>
    %32 = vector.shape_cast %31 : vector<1x16x32xbf16> to vector<16x32xbf16>
    %cst_34 = arith.constant dense<0.000000e+00> : vector<16x256xf32>
    %33 = tpu.matmul %32, %30, %cst_34 {dimension_numbers = #tpu.dot_dimension_numbers<[1], [0], [0], [1], [0, 0, 1, 1], [], []>} : vector<16x32xbf16>, vector<32x256xbf16>, vector<16x256xf32> -> vector<16x256xf32>
    %34 = arith.addf %26, %33 : vector<16x256xf32>
    %c0_35 = arith.constant 0 : index
    %c2 = arith.constant 2 : index
    %35 = vector.load %arg9[%c0_35, %c2] : memref<32x290xbf16, #tpu.memory_space<vmem>>, vector<32x256xbf16>
    %c2_36 = arith.constant 2 : index
    %c0_37 = arith.constant 0 : index
    %36 = vector.load %arg6[%c2_36, %c0_37] : memref<9x256xbf16, #tpu.memory_space<vmem>>, vector<1x256xbf16>
    %37 = vector.broadcast %36 : vector<1x256xbf16> to vector<32x256xbf16>
    %38 = arith.mulf %35, %37 : vector<32x256xbf16>
    %c2_38 = arith.constant 2 : index
    %c0_39 = arith.constant 0 : index
    %c0_40 = arith.constant 0 : index
    %39 = vector.load %arg4[%c2_38, %c0_39, %c0_40] : memref<9x16x32xbf16, #tpu.memory_space<vmem>>, vector<1x16x32xbf16>
    %40 = vector.shape_cast %39 : vector<1x16x32xbf16> to vector<16x32xbf16>
    %cst_41 = arith.constant dense<0.000000e+00> : vector<16x256xf32>
    %41 = tpu.matmul %40, %38, %cst_41 {dimension_numbers = #tpu.dot_dimension_numbers<[1], [0], [0], [1], [0, 0, 1, 1], [], []>} : vector<16x32xbf16>, vector<32x256xbf16>, vector<16x256xf32> -> vector<16x256xf32>
    %42 = arith.addf %34, %41 : vector<16x256xf32>
    %c0_42 = arith.constant 0 : index
    %c16_43 = arith.constant 16 : index
    %43 = vector.load %arg9[%c0_42, %c16_43] : memref<32x290xbf16, #tpu.memory_space<vmem>>, vector<32x256xbf16>
    %c3 = arith.constant 3 : index
    %c0_44 = arith.constant 0 : index
    %44 = vector.load %arg6[%c3, %c0_44] : memref<9x256xbf16, #tpu.memory_space<vmem>>, vector<1x256xbf16>
    %45 = vector.broadcast %44 : vector<1x256xbf16> to vector<32x256xbf16>
    %46 = arith.mulf %43, %45 : vector<32x256xbf16>
    %c3_45 = arith.constant 3 : index
    %c0_46 = arith.constant 0 : index
    %c0_47 = arith.constant 0 : index
    %47 = vector.load %arg4[%c3_45, %c0_46, %c0_47] : memref<9x16x32xbf16, #tpu.memory_space<vmem>>, vector<1x16x32xbf16>
    %48 = vector.shape_cast %47 : vector<1x16x32xbf16> to vector<16x32xbf16>
    %cst_48 = arith.constant dense<0.000000e+00> : vector<16x256xf32>
    %49 = tpu.matmul %48, %46, %cst_48 {dimension_numbers = #tpu.dot_dimension_numbers<[1], [0], [0], [1], [0, 0, 1, 1], [], []>} : vector<16x32xbf16>, vector<32x256xbf16>, vector<16x256xf32> -> vector<16x256xf32>
    %50 = arith.addf %42, %49 : vector<16x256xf32>
    %c0_49 = arith.constant 0 : index
    %c18 = arith.constant 18 : index
    %51 = vector.load %arg9[%c0_49, %c18] : memref<32x290xbf16, #tpu.memory_space<vmem>>, vector<32x256xbf16>
    %c5 = arith.constant 5 : index
    %c0_50 = arith.constant 0 : index
    %52 = vector.load %arg6[%c5, %c0_50] : memref<9x256xbf16, #tpu.memory_space<vmem>>, vector<1x256xbf16>
    %53 = vector.broadcast %52 : vector<1x256xbf16> to vector<32x256xbf16>
    %54 = arith.mulf %51, %53 : vector<32x256xbf16>
    %c5_51 = arith.constant 5 : index
    %c0_52 = arith.constant 0 : index
    %c0_53 = arith.constant 0 : index
    %55 = vector.load %arg4[%c5_51, %c0_52, %c0_53] : memref<9x16x32xbf16, #tpu.memory_space<vmem>>, vector<1x16x32xbf16>
    %56 = vector.shape_cast %55 : vector<1x16x32xbf16> to vector<16x32xbf16>
    %cst_54 = arith.constant dense<0.000000e+00> : vector<16x256xf32>
    %57 = tpu.matmul %56, %54, %cst_54 {dimension_numbers = #tpu.dot_dimension_numbers<[1], [0], [0], [1], [0, 0, 1, 1], [], []>} : vector<16x32xbf16>, vector<32x256xbf16>, vector<16x256xf32> -> vector<16x256xf32>
    %58 = arith.addf %50, %57 : vector<16x256xf32>
    %c0_55 = arith.constant 0 : index
    %c32 = arith.constant 32 : index
    %59 = vector.load %arg9[%c0_55, %c32] : memref<32x290xbf16, #tpu.memory_space<vmem>>, vector<32x256xbf16>
    %c6 = arith.constant 6 : index
    %c0_56 = arith.constant 0 : index
    %60 = vector.load %arg6[%c6, %c0_56] : memref<9x256xbf16, #tpu.memory_space<vmem>>, vector<1x256xbf16>
    %61 = vector.broadcast %60 : vector<1x256xbf16> to vector<32x256xbf16>
    %62 = arith.mulf %59, %61 : vector<32x256xbf16>
    %c6_57 = arith.constant 6 : index
    %c0_58 = arith.constant 0 : index
    %c0_59 = arith.constant 0 : index
    %63 = vector.load %arg4[%c6_57, %c0_58, %c0_59] : memref<9x16x32xbf16, #tpu.memory_space<vmem>>, vector<1x16x32xbf16>
    %64 = vector.shape_cast %63 : vector<1x16x32xbf16> to vector<16x32xbf16>
    %cst_60 = arith.constant dense<0.000000e+00> : vector<16x256xf32>
    %65 = tpu.matmul %64, %62, %cst_60 {dimension_numbers = #tpu.dot_dimension_numbers<[1], [0], [0], [1], [0, 0, 1, 1], [], []>} : vector<16x32xbf16>, vector<32x256xbf16>, vector<16x256xf32> -> vector<16x256xf32>
    %66 = arith.addf %58, %65 : vector<16x256xf32>
    %c0_61 = arith.constant 0 : index
    %c33 = arith.constant 33 : index
    %67 = vector.load %arg9[%c0_61, %c33] : memref<32x290xbf16, #tpu.memory_space<vmem>>, vector<32x256xbf16>
    %c7 = arith.constant 7 : index
    %c0_62 = arith.constant 0 : index
    %68 = vector.load %arg6[%c7, %c0_62] : memref<9x256xbf16, #tpu.memory_space<vmem>>, vector<1x256xbf16>
    %69 = vector.broadcast %68 : vector<1x256xbf16> to vector<32x256xbf16>
    %70 = arith.mulf %67, %69 : vector<32x256xbf16>
    %c7_63 = arith.constant 7 : index
    %c0_64 = arith.constant 0 : index
    %c0_65 = arith.constant 0 : index
    %71 = vector.load %arg4[%c7_63, %c0_64, %c0_65] : memref<9x16x32xbf16, #tpu.memory_space<vmem>>, vector<1x16x32xbf16>
    %72 = vector.shape_cast %71 : vector<1x16x32xbf16> to vector<16x32xbf16>
    %cst_66 = arith.constant dense<0.000000e+00> : vector<16x256xf32>
    %73 = tpu.matmul %72, %70, %cst_66 {dimension_numbers = #tpu.dot_dimension_numbers<[1], [0], [0], [1], [0, 0, 1, 1], [], []>} : vector<16x32xbf16>, vector<32x256xbf16>, vector<16x256xf32> -> vector<16x256xf32>
    %74 = arith.addf %66, %73 : vector<16x256xf32>
    %c0_67 = arith.constant 0 : index
    %c34 = arith.constant 34 : index
    %75 = vector.load %arg9[%c0_67, %c34] : memref<32x290xbf16, #tpu.memory_space<vmem>>, vector<32x256xbf16>
    %c8 = arith.constant 8 : index
    %c0_68 = arith.constant 0 : index
    %76 = vector.load %arg6[%c8, %c0_68] : memref<9x256xbf16, #tpu.memory_space<vmem>>, vector<1x256xbf16>
    %77 = vector.broadcast %76 : vector<1x256xbf16> to vector<32x256xbf16>
    %78 = arith.mulf %75, %77 : vector<32x256xbf16>
    %c8_69 = arith.constant 8 : index
    %c0_70 = arith.constant 0 : index
    %c0_71 = arith.constant 0 : index
    %79 = vector.load %arg4[%c8_69, %c0_70, %c0_71] : memref<9x16x32xbf16, #tpu.memory_space<vmem>>, vector<1x16x32xbf16>
    %80 = vector.shape_cast %79 : vector<1x16x32xbf16> to vector<16x32xbf16>
    %cst_72 = arith.constant dense<0.000000e+00> : vector<16x256xf32>
    %81 = tpu.matmul %80, %78, %cst_72 {dimension_numbers = #tpu.dot_dimension_numbers<[1], [0], [0], [1], [0, 0, 1, 1], [], []>} : vector<16x32xbf16>, vector<32x256xbf16>, vector<16x256xf32> -> vector<16x256xf32>
    %82 = arith.addf %74, %81 : vector<16x256xf32>
    %c0_73 = arith.constant 0 : index
    %c0_74 = arith.constant 0 : index
    %83 = vector.load %arg5[%c0_73, %c0_74] : memref<16x1xf32, #tpu.memory_space<vmem>>, vector<16x1xf32>
    %84 = vector.broadcast %83 : vector<16x1xf32> to vector<16x256xf32>
    %85 = arith.addf %82, %84 : vector<16x256xf32>
    %cst_75 = arith.constant 0.000000e+00 : f32
    %86 = vector.broadcast %cst_75 : f32 to vector<16x256xf32>
    %87 = arith.maximumf %85, %86 : vector<16x256xf32>
    %c0_76 = arith.constant 0 : index
    %c0_77 = arith.constant 0 : index
    %c0_78 = arith.constant 0 : index
    %88 = vector.load %arg7[%c0_76, %c0_77, %c0_78] : memref<1x16x256xf32, #tpu.memory_space<vmem>>, vector<1x16x256xf32>
    %89 = vector.shape_cast %88 : vector<1x16x256xf32> to vector<16x256xf32>
    %90 = vector.shape_cast %87 : vector<16x256xf32> to vector<1x16x256xf32>
    tpu.vector_store %arg7[%c0_76, %c0_77, %c0_78], %90 {strides = array<i32>} : memref<1x16x256xf32, #tpu.memory_space<vmem>>, vector<1x16x256xf32>,
    %c0_79 = arith.constant 0 : index
    %c0_80 = arith.constant 0 : index
    %c0_81 = arith.constant 0 : index
    %91 = vector.load %arg8[%c0_79, %c0_80, %c0_81] : memref<1x16x256xf32, #tpu.memory_space<vmem>>, vector<1x16x256xf32>
    %92 = vector.shape_cast %91 : vector<1x16x256xf32> to vector<16x256xf32>
    %93 = arith.subf %92, %87 : vector<16x256xf32>
    %c0_82 = arith.constant 0 : index
    %c0_83 = arith.constant 0 : index
    %c0_84 = arith.constant 0 : index
    %94 = vector.load %arg8[%c0_82, %c0_83, %c0_84] : memref<1x16x256xf32, #tpu.memory_space<vmem>>, vector<1x16x256xf32>
    %95 = vector.shape_cast %94 : vector<1x16x256xf32> to vector<16x256xf32>
    %96 = vector.shape_cast %93 : vector<16x256xf32> to vector<1x16x256xf32>
    tpu.vector_store %arg8[%c0_82, %c0_83, %c0_84], %96 {strides = array<i32>} : memref<1x16x256xf32, #tpu.memory_space<vmem>>, vector<1x16x256xf32>,
    return
  }
  func.func @transform_0(%arg0: i32) -> (i32, i32) {
    %c0_i32 = arith.constant 0 : i32
    %c0_i32_0 = arith.constant 0 : i32
    return %arg0, %c0_i32 : i32, i32
  }
  func.func @transform_1(%arg0: i32) -> (i32, i32, i32) {
    %c0_i32 = arith.constant 0 : i32
    %c0_i32_0 = arith.constant 0 : i32
    %c0_i32_1 = arith.constant 0 : i32
    return %arg0, %c0_i32, %c0_i32_0 : i32, i32, i32
  }
  func.func @transform_2(%arg0: i32) -> (i32, i32) {
    %c0_i32 = arith.constant 0 : i32
    %c0_i32_0 = arith.constant 0 : i32
    %c0_i32_1 = arith.constant 0 : i32
    return %c0_i32, %c0_i32_0 : i32, i32
  }
  func.func @transform_3(%arg0: i32) -> (i32, i32, i32) {
    %c0_i32 = arith.constant 0 : i32
    %c0_i32_0 = arith.constant 0 : i32
    %c0_i32_1 = arith.constant 0 : i32
    %c0_i32_2 = arith.constant 0 : i32
    return %c0_i32, %c0_i32_0, %c0_i32_1 : i32, i32, i32
  }
  func.func @transform_4(%arg0: i32) -> (i32, i32) {
    %c0_i32 = arith.constant 0 : i32
    %c0_i32_0 = arith.constant 0 : i32
    %c0_i32_1 = arith.constant 0 : i32
    return %c0_i32, %c0_i32_0 : i32, i32
  }
  func.func @transform_5(%arg0: i32) -> (i32, i32) {
    %c0_i32 = arith.constant 0 : i32
    %c0_i32_0 = arith.constant 0 : i32
    %c0_i32_1 = arith.constant 0 : i32
    return %c0_i32, %c0_i32_0 : i32, i32
  }
  func.func @transform_6(%arg0: i32) -> (i32, i32, i32) {
    %c0_i32 = arith.constant 0 : i32
    %c0_i32_0 = arith.constant 0 : i32
    %c0_i32_1 = arith.constant 0 : i32
    return %arg0, %c0_i32, %c0_i32_0 : i32, i32, i32
  }
  func.func @transform_7(%arg0: i32) -> (i32, i32, i32) {
    %c0_i32 = arith.constant 0 : i32
    %c0_i32_0 = arith.constant 0 : i32
    %c0_i32_1 = arith.constant 0 : i32
    return %arg0, %c0_i32, %c0_i32_0 : i32, i32, i32
  }
}

</mosaic_0001>

<bundles_post_ra>
// kernel: tpu_custom_call.1
= control target key start
LH: loop header
LB: loop body
LE: loop exit
PB: predicated region body
PF: predicated region fallthrough
CT: control target
= control target key end

     0   :  { %s3290_s0 = inlined_call_operand.hbm [shape: f32[32,64], index: 0, kind: input, shape index: {}]   ;;  %s3291_s1 = inlined_call_operand.hbm [shape: f32[2,16,256], index: 1, kind: input, shape index: {}]   ;;  %s3292_s2 = inlined_call_operand.hbm [shape: f32[64,256], index: 2, kind: input, shape index: {}]   ;;  %s3293_s3 = inlined_call_operand.hbm [shape: bf16[9,16,32], index: 3, kind: input, shape index: {}]   ;;  %s3294_s4 = inlined_call_operand.vmem [shape: f32[16,1], index: 4, kind: input, shape index: {}]   ;;  %s3295_s5 = inlined_call_operand.vmem [shape: bf16[9,256], index: 5, kind: input, shape index: {}]   ;;  %s3296_s6 = inlined_call_operand.hbm [shape: f32[2,16,256], index: 6, kind: output, shape index: {0}]   ;;  %s3297_s7 = inlined_call_operand.hbm [shape: f32[2,16,256], index: 7, kind: output, shape index: {1}]  }
   0x1   :  { %3304 = sst [smem:[#allocation22_spill]] %s3290_s0 }
   0x2   :  { %3305 = sst [smem:[#allocation23_spill]] %s3292_s2 }
   0x3   :  { %3306 = sst [smem:[#allocation24_spill]] %s3293_s3 }
   0x4   :  { %13 = vsyncpa [#allocation4], 0 }
   0x5   :  { %15 = vsyncpa [#allocation4 + $0x1], 0 }
   0x6   :  { %16 = vsyncpa [#allocation7], 0 }
   0x7   :  { %18 = vsyncpa [#allocation7 + $0x1], 0 }
   0x8   :  { %19 = vsyncpa [#allocation10], 0 }
   0x9   :  { %20 = vsyncpa [#allocation5], 0 }
   0xa   :  { %22 = vsyncpa [#allocation5 + $0x1], 0 }
   0xb   :  { %23 = vsyncpa [#allocation13], 0 }
   0xc   :  { %25 = vsyncpa [#allocation13 + $0x1], 0  ;;  %s2529_s24 = smov 0   ;;  %s2531_s25 = smov 0  }
   0xd   :  { %s2533_s26 = smov 0   ;;  %s2535_s27 = smov 0  }
   0xe LB: > { %3307 = sst [smem:[#allocation20_spill]] %s2452_s26  ;;  %s2550_s28 = sadd.s32 4294967295, %s2456_s27   ;;  %s2456_s27 = sphi %s2535_s27, %s3336_s27   ;;  %s2452_s26 = sphi %s2533_s26, %s3333_s26   ;;  %s2448_s25 = sphi %s2531_s25, %s3335_s25   ;;  %s2444_s24 = sphi %s2529_s24, %s3334_s24  }
   0xf   : > { %s1985_s29 = sadd.s32 4294967294, %s2456_s27   ;;  %p51_p0 = scmp.ne.s32.totalorder %s2448_s25, %s2444_s24 }
  0x10   : > { %p3300_p1 = scmp.eq.s32.totalorder %s2550_s28, 0  ;;  %p185_p2 = scmp.eq.s32.totalorder %s2550_s28, 1 }
  0x11   : > { %p191_p3 = scmp.eq.s32.totalorder %s1985_s29, 1  ;;  %p1986_p5 = scmp.ge.s32.totalorder %s2456_s27, 1 }
  0x12   : > { %p2559_p4 = por %p3300_p1, %p51_p0  ;;  %p224_p7 = scmp.lt.s32.totalorder %s2456_s27, 3 }
  0x13   : > { %p2564_p6 = por %p191_p3, %p51_p0  ;;  %s2458_s10 = smov [#allocation8]  }
  0x14   : > { %s3308_s30 = scalar_select %p2559_p4, 1, 0 }
  0x15   : > { %s3309_s8 = scalar_select %p2564_p6, 1, 0 }
  0x16   : > { %p2569_p8 = pnand %p1986_p5, %p224_p7  ;;  %s236_s11 = sshll.u32 %s2458_s10, 4  ;;  %s237_s11 = int_to_ptr.vmem [resolvable:$true] %s236_s11 }
  0x17   : > { %s2459_s13 = smov [#allocation9]   ;;  %s2253_s15 = scalar_lea.vmem %s237_s11, 2048 }
  0x18   : > { %p2129_p9 = pneg %p2569_p8  ;;  %s249_s14 = sshll.u32 %s2459_s13, 4  ;;  %s250_s14 = int_to_ptr.vmem [resolvable:$true] %s249_s14 }
  0x19   : > { %p2254_p13 = scmp.ne.s32.totalorder %s237_s11, %s2253_s15  ;;  %p2261_p5 = scmp.lt.s32.totalorder %s237_s11, %s237_s11 }
  0x1a   : > { %p2578_p11 = pnand %p2129_p9, %p3300_p1  ;;  %p2262_p7 = scmp.lt.s32.totalorder %s2253_s15, %s2253_s15 }
  0x1c   : > { %p2244_p12 = pneg %p2578_p11  ;;  %p2263_p10 = por %p2262_p7, %p2261_p5 }
  0x1e   : > { %p2256_p0 = pnand %p2254_p13, %p2244_p12 }
  0x20   : > { %p2257_p3 = pneg %p2256_p0 }
  0x22   : > { %p2264_p9 = pnand %p2263_p10, %p2257_p3 }
  0x24   : > { %2267 = shalt.err (!%p2264_p9)
}
  0x25   : > { %s3298_s16 = smov 256   ;;  %s3299_s17 = smov 16  }
  0x26   : > { %s3312_s2 = sld [smem:[#allocation23_spill]]  ;;  %s2279_s20 = scalar_lea.vmem %s250_s14, 1152 }
  0x27   : > { %p2280_p13 = scmp.ne.s32.totalorder %s250_s14, %s2279_s20  ;;  %p2287_p10 = scmp.lt.s32.totalorder %s250_s14, %s250_s14 }
  0x28   : > { %p2288_p3 = scmp.lt.s32.totalorder %s2279_s20, %s2279_s20 }
  0x29   : > { %p2282_p0 = pnand %p2280_p13, %p2244_p12 }
  0x2a   : > { %p2289_p7 = por %p2288_p3, %p2287_p10 }
  0x2b   : > { %p2283_p5 = pneg %p2282_p0 }
  0x2c   : > { %2132 = dma.hbm_to_vmem [thread:$0]  (!%p2578_p11), %s3312_s2, 2048, %s237_s11, [#allocation7], %s3298_s16, %s3298_s16, %s3299_s17  }
  0x2d   : > { %p2290_p9 = pnand %p2289_p7, %p2283_p5 }
  0x2f   : > { %2293 = shalt.err (!%p2290_p9)
}
  0x30   : > { %s2462_s21 = smov 64   ;;  %s2463_s22 = smov 4  }
  0x31   : > { %s3313_s3 = sld [smem:[#allocation24_spill]]  ;;  %s2604_s10 = sadd.s32 1, %s2456_s27  }
  0x32   : > { %s35_s11 = ssub.s32 %s2456_s27, %s2604_s10  ;;  %s38_s13 = sadd.s32 1, %s2452_s26 }
  0x33   : > { %p36_p12 = scmp.eq.s32.totalorder %s35_s11, 0  ;;  %p45_p13 = scmp.ne.s32.totalorder %s2452_s26, %s2448_s25 }
  0x34   : > { %p46_p0 = scmp.eq.s32.totalorder %s2456_s27, 0  ;;  %p2152_p3 = scmp.lt.s32.totalorder %s2456_s27, 2 }
  0x35   : > { %s2613_s15 = scalar_select %p36_p12, %s2452_s26, %s38_s13  }
  0x36   : > { %p47_p5 = por %p46_p0, %p45_p13  ;;  %p2617_p10 = por %p185_p2, %p45_p13 }
  0x37   : > { %2135 = dma.hbm_to_vmem [thread:$0]  (!%p2578_p11), %s3313_s3, 1152, %s250_s14, [#allocation10], %s2462_s21, %s2462_s21, %s2463_s22  }
  0x38   : > { %3314 = sst [smem:[#allocation21_spill]] %s2613_s15  ;;  %s2623_s12 = sand.u32 1, %s2452_s26  }
  0x39   : > { %s3315_s18 = scalar_select %p2617_p10, 1, 0 }
  0x3a   : > { %s1990_s14 = sshll.u32 %s2623_s12, 4  ;;  %s2105_s19 = sshll.u32 %s2456_s27, 8 }
  0x3b   : > { %s3316_s0 = sld [smem:[#allocation22_spill]]  ;;  %s273_s23 = scalar_lea.vmem [#allocation3], %s1990_s14 }
  0x3c   : > { %s280_s29 = sshll.u32 %s273_s23, 4  ;;  %p2634_p2 = pnand %p2152_p3, %p47_p5  ;;  %s2632_s29 = int_to_ptr.vmem [resolvable:$true] %s280_s29 }
  0x3e   : > { %p2296_p7 = pneg %p2634_p2 }
  0x41   : > { %s2630_s22 = scalar_lea.hbm %s3316_s0, %s2105_s19  ;;  %s2299_s20 = scalar_lea.hbm %s3316_s0, 512 }
  0x42   : > { %s2294_s17 = scalar_lea.hbm %s2630_s22, 256  ;;  %p2300_p13 = scmp.lt.s32.totalorder %s2630_s22, %s3316_s0 }
  0x43   : > { %p2295_p11 = scmp.ne.s32.totalorder %s2630_s22, %s2294_s17  ;;  %p2301_p0 = scmp.lt.s32.totalorder %s2299_s20, %s2294_s17 }
  0x45   : > { %p2297_p9 = pnand %p2296_p7, %p2295_p11  ;;  %p2302_p5 = por %p2301_p0, %p2300_p13 }
  0x47   : > { %p2298_p12 = pneg %p2297_p9 }
  0x49   : > { %p2303_p3 = pnand %p2302_p5, %p2298_p12 }
  0x4b   : > { %2306 = shalt.err (!%p2303_p3)
}
  0x4c   : > { %s2307_s13 = scalar_lea.vmem %s2632_s29, 256  ;;  %s2464_s14 = smov [#allocation3]  }
  0x4d   : > { %p2308_p1 = scmp.ne.s32.totalorder %s2632_s29, %s2307_s13  ;;  %s2312_s19 = sshll.u32 %s2464_s14, 4  ;;  %s2313_s19 = int_to_ptr.vmem [resolvable:$false] %s2312_s19 }
  0x4e   : > { %s2314_s16 = scalar_lea.vmem %s2313_s19, 512  ;;  %p2315_p6 = scmp.lt.s32.totalorder %s2632_s29, %s2313_s19 }
  0x4f   : > { %p2310_p11 = pnand %p2308_p1, %p2296_p7  ;;  %p2316_p10 = scmp.lt.s32.totalorder %s2314_s16, %s2307_s13 }
  0x51   : > { %p2311_p9 = pneg %p2310_p11  ;;  %p2317_p4 = por %p2316_p10, %p2315_p6 }
  0x53   : > { %p2318_p13 = pnand %p2317_p4, %p2311_p9 }
  0x55   : > { %2321 = shalt.err (!%p2318_p13)
}
  0x56   : > { %s2465_s17 = smov 128   ;;  %s2466_s20 = smov 8  }
  0x57   : > { %s3318_s21 = scalar_lea.sflag [#allocation4], %s2623_s12  ;;  %s1993_s23 = sshll.u32 %s2623_s12, 5 }
  0x58   : > { %2139 = dma.hbm_to_vmem [thread:$0]  (!%p2634_p2), %s2630_s22, 256, %s2632_s29, %s3318_s21, %s2465_s17, %s2465_s17, %s2466_s20  }
  0x59   : > { %s2106_s14 = sshll.u32 %s2456_s27, 9  ;;  %s294_s0 = scalar_lea.vmem [#allocation6], %s1993_s23 }
  0x5a   : > { %s2671_s13 = scalar_lea.hbm %s3291_s1, %s2106_s14  ;;  %s301_s2 = sshll.u32 %s294_s0, 4  ;;  %s2673_s2 = int_to_ptr.vmem [resolvable:$true] %s301_s2 }
  0x5b   : > { %s3319_s3 = sand.u32 1, %s2456_s27   ;;  %s2322_s26 = scalar_lea.hbm %s2671_s13, 512 }
  0x5c   : > { %s291_s15 = scalar_lea.sflag [#allocation7], %s3319_s3  ;;  %p2323_p1 = scmp.ne.s32.totalorder %s2671_s13, %s2322_s26 }
  0x5d   : > { %s2327_s29 = scalar_lea.hbm %s3291_s1, 1024  ;;  %p2328_p10 = scmp.lt.s32.totalorder %s2671_s13, %s3291_s1 }
  0x5e   : > { %p2325_p4 = pnand %p2323_p1, %p2296_p7  ;;  %p2329_p12 = scmp.lt.s32.totalorder %s2327_s29, %s2322_s26 }
  0x60   : > { %p2326_p6 = pneg %p2325_p4  ;;  %p2330_p0 = por %p2329_p12, %p2328_p10 }
  0x62   : > { %p2331_p5 = pnand %p2330_p0, %p2326_p6 }
  0x64   : > { %2334 = shalt.err (!%p2331_p5)
}
  0x65   : > { %s2335_s0 = scalar_lea.vmem %s2673_s2, 512  ;;  %s2467_s3 = smov [#allocation6]  }
  0x66   : > { %p2336_p3 = scmp.ne.s32.totalorder %s2673_s2, %s2335_s0  ;;  %s2340_s21 = sshll.u32 %s2467_s3, 4  ;;  %s2341_s21 = int_to_ptr.vmem [resolvable:$false] %s2340_s21 }
  0x67   : > { %s2342_s23 = scalar_lea.vmem %s2341_s21, 1024  ;;  %p2343_p13 = scmp.lt.s32.totalorder %s2673_s2, %s2341_s21 }
  0x68   : > { %p2338_p11 = pnand %p2336_p3, %p2296_p7  ;;  %p2344_p1 = scmp.lt.s32.totalorder %s2342_s23, %s2335_s0 }
  0x6a   : > { %p2339_p9 = pneg %p2338_p11  ;;  %p2345_p4 = por %p2344_p1, %p2343_p13 }
  0x6c   : > { %p2346_p10 = pnand %p2345_p4, %p2339_p9 }
  0x6e   : > { %2349 = shalt.err (!%p2346_p10)
}
  0x6f   : > { %s3320_s26 = smov 16   ;;  %s3321_s14 = smov 256  }
  0x70   : > { %2142 = dma.hbm_to_vmem [thread:$0]  (!%p2634_p2), %s2671_s13, 512, %s2673_s2, %s291_s15, %s3321_s14, %s3321_s14, %s3320_s26  }
  0x71   : > { %313 = sbr.rel (%p2569_p8) target bundleno = 889 (0x379), region = 44  ;;  %s2705_s19 = sand.u32 (!%p2569_p8), 1, %s2448_s25  }
  0x72   : > { %s1997_s16 = sshll.u32 (!%p2569_p8), %s2705_s19, 4  ;;  %s316_s12 = scalar_lea.sflag (!%p2569_p8), [#allocation4], %s2705_s19 }
  0x73   : > { %s2709_s22 = scalar_lea.vmem (!%p2569_p8), [#allocation3], %s1997_s16  ;;  %p3322_p7 = scmp.ne.s32.totalorder (!%p2569_p8), %s3308_s30, 0 }
  0x76   : > { %2419 = dma.done.wait (%p3322_p7), %s316_s12, 256  }
  0x77   : > { %2421 = vsyncadd (%p3322_p7), %s316_s12, 4294967040  ;;  %s324_s2 = sand.u32 1, %s2550_s28   ;;  %s2717_s9 = sshll.u32 %s2705_s19, 5 }
  0x78   : > { %s325_s15 = scalar_lea.sflag [#allocation7], %s324_s2  ;;  %s2720_s11 = scalar_lea.vmem [#allocation6], %s2717_s9 }
  0x79   : > { %2423 = dma.done.wait (%p3322_p7), %s325_s15, 512  }
  0x7a   : > { %2425 = vsyncadd (%p3322_p7), %s325_s15, 4294966784  ;;  %p3323_p8 = scmp.eq.s32.totalorder %s2550_s28, 0 }
  0x7c   : > { %2427 = dma.done.wait (%p3323_p8), [#allocation7], 2048   ;;  %p3324_p2 = pmov %p3323_p8 }
  0x7e   : > { %2429 = vsyncadd (%p3324_p2), [#allocation7], 4294965248  ;;  %p3325_p6 = pmov %p3324_p2 }
  0x7f   : > { %p3326_p12 = pmov %p3324_p2 }
  0x80   : > { %2431 = dma.done.wait (%p3325_p6), [#allocation10], 1152  }
  0x81   : > { %2433 = vsyncadd (%p3326_p12), [#allocation10], 4294966144  ;;  %v2468_v0 = vmov 0.0   ;;  %v575_v1 = vlaneseq  ;;  %v406_v2 = vld [vmem:[#allocation8 + $0x78] sm:$0xff]  ;;  %v405_v3 = vld [vmem:[#allocation8 + $0x70] sm:$0xff]  ;;  %vm407_vm0 = vcmask 523264  }
  0x82   : > { %478 = vmatprep.mubr.f32.mxu0 %v2468_v0  ;;  %v404_v4 = vld [vmem:[#allocation8 + $0x68] sm:$0xff]  ;;  %430 = vmatprep.subr.mxu0 %v406_v2  ;;  %v403_v5 = vld [vmem:[#allocation8 + $0x60] sm:$0xff]  ;;  %v402_v6 = vld [vmem:[#allocation8 + $0x58] sm:$0xff]  ;;  %s2469_s3 = smov 17   ;;  %s2470_s16 = smov 32   ;;  %vm379_vm1 = vcmask 134144  }
  0x83   : > { %431 = vmatpush1.msra.mxu0 %v405_v3  ;;  %v2735_v7 = vshrl.u32 %v575_v1, 7  ;;  %v401_v8 = vld [vmem:[#allocation8 + $0x50] sm:$0xff]  ;;  %v400_v9 = vld [vmem:[#allocation8 + $0x48] sm:$0xff]  ;;  %v399_v10 = vld [vmem:[#allocation8 + $0x40] sm:$0xff]  ;;  %s2471_s12 = smov 2   ;;  %s2472_s2 = smov 1  }
  0x84   : > { %432 = vmatprep.subr.mxu0 %v404_v4  ;;  %v398_v11 = vld [vmem:[#allocation8 + $0x38] sm:$0xff]  ;;  %v397_v12 = vld [vmem:[#allocation8 + $0x30] sm:$0xff]  ;;  %v396_v13 = vld [vmem:[#allocation8 + $0x28] sm:$0xff]  ;;  %s2474_s15 = smov 18   ;;  %vm384_vm2 = vcmask 273544   ;;  %vm518_vm3 = vcmask 1043592  }
  0x85   : > { %433 = vmatpush1.msra.mxu0 %v403_v5  ;;  %v525_v14 = vld [vmem:[%s2720_s11] sm:$0xff]  ;;  %v526_v15 = vld [vmem:[%s2720_s11 + $0x8] sm:$0xff]  ;;  %v527_v16 = vld [vmem:[%s2720_s11 + $0x10] sm:$0xff]  ;;  %v2741_v17 = vsub.s32 3, %v2735_v7  ;;  %v2744_v18 = vsub.s32 0, %v2735_v7  ;;  %v2747_v19 = vsub.s32 1, %v2735_v7 }
  0x86   : > { %434 = vmatprep.subr.mxu0 %v402_v6  ;;  %v2109_v20 = vpack.c.bf16 %v526_v15, %v525_v14  ;;  %v528_v21 = vld [vmem:[%s2720_s11 + $0x18] sm:$0xff]  ;;  %v1338_v22 = vld [vmem:[%s3295_s5] sm:$0x88]  ;;  %v566_v23 = vld [vmem:[%s3295_s5] sm:$0x11]  ;;  %v1203_v24 = vsub.s32 2, %v2735_v7 }
  0x87   : > { %435 = vmatpush1.msra.mxu0 %v401_v8  ;;  %v395_v25 = vld [vmem:[#allocation8 + $0x20] sm:$0xff]  ;;  %v394_v26 = vld [vmem:[#allocation8 + $0x18] sm:$0xff]  ;;  %v2110_v27 = vpack.c.bf16 %v528_v21, %v527_v16  ;;  %v2757_v28 = vcombine.low %v1338_v22, %v1338_v22  ;;  %v2759_v29 = vcombine.high %v1338_v22, %v1338_v22  ;;  %v2761_v30 = vcombine.low %v566_v23, %v566_v23  ;;  %v907_v31 = vld [vmem:[%s3295_s5] sm:$0x22]  ;;  %s2475_s11 = smov 34   ;;  %s2477_s30 = smov 111  }
  0x88   : > { %436 = vmatprep.subr.mxu0 %v400_v9  ;;  %539 = vrot.lane.b32.xlu0 %v2109_v20, %s2469_s3  ;;  %v2767_v32 = vcombine.high %v566_v23, %v566_v23  ;;  %v2035_v33 = vcombine.low %v907_v31, %v907_v31  ;;  %v2036_v34 = vcombine.high %v907_v31, %v907_v31  ;;  %v1191_v35 = vld [vmem:[%s3295_s5] sm:$0x44]  ;;  %v392_v40 = vld [vmem:[#allocation8 + $0x8] sm:$0xff]  ;;  %v1622_v44 = vld [vmem:[%s3295_s5 + $0x8] sm:$0x11]  ;;  %v2476_v21 = vmov 0  }
  0x89   : > { %437 = vmatpush1.msra.mxu0 %v399_v10  ;;  %v393_v36 = vld [vmem:[#allocation8 + $0x10] sm:$0xff]  ;;  %v1345_v37 = vpack.i.b16 %v2757_v28, %v2757_v28  ;;  %v1352_v38 = vpack.i.b16 %v2759_v29, %v2759_v29  ;;  %v768_v39 = vshrl.u32 %v2761_v30, 16  ;;  %v391_v45 = vld [vmem:[#allocation8] sm:$0xff]  ;;  %v2055_v58 = vcombine.low %v1191_v35, %v1191_v35  ;;  %v390_v8 = vld [vmem:[%s2709_s22 + $0x8] sm:$0xff]  ;;  %382 = vst.msk [vmem:[#allocation2 + $0x18] sm:$0xf] %vm379_vm1, %v2476_v21 }
  0x8a   : > { %438 = vmatprep.subr.mxu0 %v398_v11  ;;  %v775_v41 = vshrl.u32 %v2767_v32, 16  ;;  %v914_v42 = vpack.i.b16 %v2035_v33, %v2035_v33  ;;  %v921_v43 = vpack.i.b16 %v2036_v34, %v2036_v34  ;;  %v1052_v49 = vshrl.u32 %v2035_v33, 16  ;;  %v389_v50 = vld [vmem:[%s2709_s22] sm:$0xff]  ;;  %s2473_s22 = smov 16   ;;  %387 = vst.msk [vmem:[#allocation2 + $0x20] sm:$0xf] %vm384_vm2, %v2476_v21  ;;  %659 = vmatprep.mubr.bf16.mxu1 %v2476_v21 }
  0x8b   : > { %439 = vmatpush1.msra.mxu0 %v397_v12  ;;  %v1350_v46 = vrot.slane %v1345_v37, %v2741_v17  ;;  %v1357_v47 = vrot.slane %v1352_v38, %v2741_v17  ;;  %v769_v48 = vpack.i.b16 %v768_v39, %v768_v39  ;;  %v1059_v54 = vshrl.u32 %v2036_v34, 16  ;;  %380 = vst.msk [vmem:[#allocation2] sm:$0xf] %vm379_vm1, %v2476_v21  ;;  %s2478_s13 = smov 127   ;;  %s2479_s29 = smov 126  }
  0x8c   : > { %440 = vmatprep.subr.mxu0 %v396_v13  ;;  %541 = vrot.lane.b32.xlu0 %v2110_v27, %s2469_s3  ;;  %v776_v51 = vpack.i.b16 %v775_v41, %v775_v41  ;;  %v919_v52 = vrot.slane %v914_v42, %v2747_v19  ;;  %v926_v53 = vrot.slane %v921_v43, %v2747_v19  ;;  %v1198_v1 = vshrl.u32 %v2055_v58, 16  ;;  %s2480_s17 = smov 112   ;;  %s2481_s20 = smov 110  }
  0x8d   : > { %441 = vmatpush1.msra.mxu0 %v395_v25  ;;  %v2068_v55 = vcombine.low %v1350_v46, %v1357_v47  ;;  %v774_v56 = vrot.slane %v769_v48, %v2744_v18  ;;  %v1053_v57 = vpack.i.b16 %v1052_v49, %v1052_v49  ;;  %v1060_v61 = vpack.i.b16 %v1059_v54, %v1059_v54  ;;  %s2482_s0 = smov 96   ;;  %s2916_s21 = scalar_lea.vmem [#allocation12], %s2717_s9 }
  0x8e   : > { %442 = vmatprep.subr.mxu0 %v394_v26  ;;  %v781_v59 = vrot.slane %v776_v51, %v2744_v18  ;;  %v2037_v60 = vcombine.low %v919_v52, %v926_v53  ;;  %v2056_v62 = vcombine.high %v1191_v35, %v1191_v35  ;;  %v2086_v2 = vcombine.low %v1622_v44, %v1622_v44  ;;  %s2483_s23 = smov 33   ;;  %s2485_s26 = smov 94  }
  0x8f   : > { %443 = vmatpush1.msra.mxu0 %v393_v36  ;;  %v1058_v63 = vrot.slane %v1053_v57, %v2747_v19  ;;  %v2087_v3 = vcombine.high %v1622_v44, %v1622_v44  ;;  %v1065_v5 = vrot.slane %v1060_v61, %v2747_v19  ;;  %v1199_v9 = vpack.i.b16 %v1198_v1, %v1198_v1  ;;  %p3329_p5 = scmp.ne.s32.totalorder %s3315_s18, 0 }
  0x90   : > { %444 = vmatprep.subr.mxu0 %v392_v40  ;;  %1363 = vrot.lane.b32.xlu0 %v2068_v55, %s2470_s16  ;;  %v2026_v4 = vcombine.low %v774_v56, %v781_v59  ;;  %v1206_v6 = vshrl.u32 %v2056_v62, 16  ;;  %v1629_v10 = vpack.i.b16 %v2086_v2, %v2086_v2  ;;  %381 = vst.msk [vmem:[#allocation2 + $0xc] sm:$0xf] %vm379_vm1, %v2476_v21  ;;  %383 = vst.msk [vmem:[#allocation2 + $0x24] sm:$0xf] %vm379_vm1, %v2476_v21  ;;  %vm519_vm4 = vcmask 1047556  }
  0x91   : > { %445 = vmatpush1.msra.mxu0 %v391_v45  ;;  %932 = vrot.lane.b32.xlu1 %v2037_v60, %s2471_s12  ;;  %v1636_v11 = vpack.i.b16 %v2087_v3, %v2087_v3  ;;  %v2046_v13 = vcombine.low %v1058_v63, %v1065_v5  ;;  %v1204_v14 = vrot.slane %v1199_v9, %v1203_v24  ;;  %vm511_vm5 = vcmask 138240   ;;  %vm2822_vm6 = vmor %vm519_vm4, %vm518_vm3 }
  0x92   : > { %2003 = vmatmul.mubr.msk.f32.vlgmr.msra.gmra.mxu0 %vm407_vm0, %v389_v50  ;;  %v1207_v12 = vpack.i.b16 %v1206_v6, %v1206_v6  ;;  %385 = vst.msk [vmem:[#allocation2 + $0x8] sm:$0xf] %vm384_vm2, %v2476_v21  ;;  %386 = vst.msk [vmem:[#allocation2 + $0x14] sm:$0xf] %vm384_vm2, %v2476_v21  ;;  %2215 = vset.pattern.permute.xlu1 %v2476_v21  ;;  %v573_v7 = vpack.i.b16 %v2761_v30, %v2761_v30  ;;  %vm790_vm7 = vcmask 7168   ;;  %vm1074_vm8 = vcmask 130048  }
  0x93   : > { %484 = vmatprep.mubr.f32.mxu0 %v2468_v0  ;;  %v1634_v0 = vrot.slane %v1629_v10, %v2744_v18  ;;  %v1641_v16 = vrot.slane %v1636_v11, %v2744_v18  ;;  %388 = vst.msk [vmem:[#allocation2 + $0x2c] sm:$0xf] %vm384_vm2, %v2476_v21  ;;  %2216 = vset.pattern.permute.xlu0 %v2476_v21  ;;  %vm623_vm9 = vcmask 261120   ;;  %vm935_vm10 = vcmask 15360  }
  0x94   : > { %787 = vrot.lane.b32.xlu0 %v2026_v4, %s2472_s2  ;;  %v1212_v15 = vrot.slane %v1207_v12, %v1203_v24  ;;  %v580_v22 = vpack.i.b16 %v2767_v32, %v2767_v32  ;;  %v578_v27 = vrot.slane %v573_v7, %v2744_v18  ;;  %v1483_v12 = vshrl.u32 %v2757_v28, 16 }
  0x95   : > { %v2088_v20 = vcombine.low %v1634_v0, %v1641_v16  ;;  %vm1221_vm11 = vcmask 146432   ;;  %vm1650_vm12 = vcmask 277504   ;;  %vm1505_vm13 = vcmask 269312  }
  0x96   : > { %2004 = vmatmul.mubr.msk.f32.gmra.mxu0 %vm407_vm0, %v390_v8  ;;  %v2057_v19 = vcombine.low %v1204_v14, %v1212_v15  ;;  %v585_v31 = vrot.slane %v580_v22, %v2744_v18  ;;  %v1484_v15 = vpack.i.b16 %v1483_v12, %v1483_v12  ;;  %vm713_vm14 = vcmask 908288  }
  0x97   : > { %892 = vmatprep.mubr.bf16.mxu0 %v2476_v21  ;;  %vm848_vm15 = vcmask 1039360   ;;  %vm993_vm0 = vcmask 1031168   ;;  %vm1279_vm2 = vcmask 900096   ;;  %vm1424_vm3 = vcmask 785408  }
  0x98   : > { %1071 = vrot.lane.b32.xlu0 %v2046_v13, %s2473_s22  ;;  %1218 = vrot.lane.b32.xlu1 %v2057_v19, %s2474_s15  ;;  %v2832_v33 = vcombine.low %v578_v27, %v585_v31  ;;  %v1490_v13 = vshrl.u32 %v2759_v29, 16  ;;  %v1489_v28 = vrot.slane %v1484_v15, %v2741_v17  ;;  %vm1563_vm4 = vcmask 777216   ;;  %s369_s15 = scalar_lea.vmem [#allocation11], %s2717_s9  ;;  %s1838_s9 = sshll.u32 %s2916_s21, 4  ;;  %s3219_s9 = int_to_ptr.vmem [resolvable:$true] %s1838_s9 }
  0x9a   : > { %v1491_v0 = vpack.i.b16 %v1490_v13, %v1490_v13 }
  0x9c   : > { %1647 = vrot.lane.b32.xlu0 %v2088_v20, %s2475_s11  ;;  %v1496_v29 = vrot.slane %v1491_v0, %v2741_v17  ;;  %s1822_s11 = sshll.u32 %s369_s15, 4  ;;  %s3200_s11 = int_to_ptr.vmem [resolvable:$true] %s1822_s11 }
  0xfa   : > { %v540_v23 = vpop.permute.xlu0 %539 }
  0xfb   : > { %v543_v25 = vrot.slane %v540_v23, 4 }
  0xfd   : > { %v545_v26 = vsel %vm511_vm5, %v543_v25, %v540_v23  ;;  %552 = vst.msk [vmem:[#allocation2 + $0x20] sm:$0xf] %vm379_vm1, %v543_v25  ;;  %v2077_v23 = vcombine.low %v1489_v28, %v1496_v29 }
  0xfe   : > { %551 = vst.msk [vmem:[#allocation2 + $0x18] sm:$0xff] %vm2822_vm6, %v545_v26  ;;  %v542_v30 = vpop.permute.xlu0 %541 }
  0xff   : > { %v544_v32 = vrot.slane %v542_v30, 4 }
 0x101   : > { %v546_v34 = vsel %vm511_vm5, %v544_v32, %v542_v30  ;;  %554 = vst.msk [vmem:[#allocation2 + $0x2c] sm:$0xf] %vm379_vm1, %v544_v32 }
 0x102   : > { %553 = vst.msk [vmem:[#allocation2 + $0x24] sm:$0xff] %vm2822_vm6, %v546_v34  ;;  %v1364_v35 = vpop.permute.xlu0 %1363 }
 0x103   : > { %v2844_v39 = vpop.permute.xlu1 %932  ;;  %v2888_v1 = vrot.slane %v1364_v35, 4 }
 0x104   : > { %v2838_v37 = vld [vmem:[#allocation2 + $0x20] sm:$0xf]  ;;  %v2861_v47 = vrot.slane %v2844_v39, 4 }
 0x105   : > { %v2846_v40 = vld [vmem:[#allocation2 + $0x18] sm:$0xff]  ;;  %v2897_v5 = vsel %vm623_vm9, %v2888_v1, %v1364_v35 }
 0x106   : > { %v788_v36 = vpop.permute.xlu0 %787  ;;  %v944_v51 = vmul.bf16 %v2861_v47, %v2838_v37  ;;  %v594_v54 = vmul.bf16 %v2832_v33, %v2846_v40  ;;  %v1374_v6 = vmul.bf16 %v2897_v5, %v2846_v40  ;;  %v2935_v31 = vsel %vm935_vm10, %v2861_v47, %v2844_v39 }
 0x107   : > { %v2840_v18 = vrot.slane %v788_v36, 4  ;;  %v943_v30 = vmul.bf16 %v2935_v31, %v2846_v40 }
 0x108   : > { %v2842_v38 = vld [vmem:[#allocation2 + $0x2c] sm:$0xf] }
 0x109   : > { %v2848_v41 = vld [vmem:[#allocation2 + $0x24] sm:$0xff]  ;;  %v2851_v42 = vsel %vm790_vm7, %v2840_v18, %v788_v36  ;;  %v2024_v43 = vcombine.low %v2838_v37, %v2842_v38  ;;  %v946_v52 = vmul.bf16 %v2861_v47, %v2842_v38  ;;  %v799_v17 = vmul.bf16 %v2840_v18, %v2838_v37 }
 0x10a   : > { %v798_v44 = vmul.bf16 %v2851_v42, %v2846_v40  ;;  %v800_v45 = vmul.bf16 %v2851_v42, %v2848_v41  ;;  %v1072_v46 = vpop.permute.xlu0 %1071  ;;  %v595_v58 = vmul.bf16 %v2832_v33, %v2848_v41  ;;  %v2882_v59 = vpop.permute.xlu1 %1218  ;;  %v1376_v8 = vmul.bf16 %v2897_v5, %v2848_v41 }
 0x10b   : > { %711 = vrot.lane.b32.xlu0 %v2024_v43, %s2477_s30  ;;  %v2863_v49 = vrot.slane %v1072_v46, 4  ;;  %v2044_v57 = vcombine.low %v944_v51, %v946_v52  ;;  %v2886_v62 = vrot.slane %v2882_v59, 4  ;;  %v2023_v25 = vcombine.high %v2846_v40, %v2848_v41 }
 0x10c   : > { %v2032_v48 = vcombine.high %v798_v44, %v800_v45  ;;  %v2031_v50 = vcombine.low %v798_v44, %v800_v45  ;;  %v2016_v60 = vcombine.high %v594_v54, %v595_v58  ;;  %v2015_v61 = vcombine.low %v594_v54, %v595_v58 }
 0x10d   : > { %v2871_v53 = vsel %vm1074_vm8, %v2863_v49, %v1072_v46  ;;  %v1230_v3 = vmul.bf16 %v2886_v62, %v2838_v37  ;;  %v1232_v4 = vmul.bf16 %v2886_v62, %v2842_v38  ;;  %v2074_v10 = vcombine.high %v1374_v6, %v1376_v8 }
 0x10e   : > { %v1082_v55 = vmul.bf16 %v2871_v53, %v2846_v40  ;;  %v1084_v56 = vmul.bf16 %v2871_v53, %v2848_v41  ;;  %639 = vmatprep.subr.bf16.mxu1 %v2016_v60  ;;  %v2073_v11 = vcombine.low %v1374_v6, %v1376_v8  ;;  %v2022_v26 = vcombine.low %v2846_v40, %v2848_v41  ;;  %v1648_v58 = vpop.permute.xlu0 %1647 }
 0x10f   : > { %844 = vrot.lane.b32.xlu0 %v2032_v48, %s2478_s13  ;;  %640 = vmatpush1.bf16.msra.mxu1 %v2015_v61  ;;  %v2064_v9 = vcombine.low %v1230_v3, %v1232_v4  ;;  %v801_v27 = vmul.bf16 %v2840_v18, %v2842_v38  ;;  %v945_v32 = vmul.bf16 %v2935_v31, %v2848_v41 }
 0x110   : > { %v2052_v63 = vcombine.high %v1082_v55, %v1084_v56  ;;  %v2051_v2 = vcombine.low %v1082_v55, %v1084_v56  ;;  %v1083_v39 = vmul.bf16 %v2863_v49, %v2838_v37  ;;  %v1085_v43 = vmul.bf16 %v2863_v49, %v2842_v38 }
 0x111   : > { %v2033_v34 = vcombine.low %v799_v17, %v801_v27  ;;  %v2043_v35 = vcombine.high %v943_v30, %v945_v32  ;;  %v2042_v36 = vcombine.low %v943_v30, %v945_v32  ;;  %v2950_v44 = vsel %vm1221_vm11, %v2886_v62, %v2882_v59  ;;  %v2233_v32 = vld [vmem:[#allocation9] sm:$0xff]  }
 0x112   : > { %v1229_v45 = vmul.bf16 %v2950_v44, %v2846_v40  ;;  %v1231_v46 = vmul.bf16 %v2950_v44, %v2848_v41  ;;  %v2053_v48 = vcombine.low %v1083_v39, %v1085_v43  ;;  %v1375_v52 = vmul.bf16 %v2888_v1, %v2838_v37 }
 0x113   : > { %842 = vrot.lane.b32.xlu0 %v2031_v50, %s2478_s13  ;;  %v1377_v54 = vmul.bf16 %v2888_v1, %v2842_v38 }
 0x114   : > { %v2063_v50 = vcombine.high %v1229_v45, %v1231_v46  ;;  %v2062_v51 = vcombine.low %v1229_v45, %v1231_v46 }
 0x115   : > { %v2075_v55 = vcombine.low %v1375_v52, %v1377_v54 }
 0x117   : > { %991 = vrot.lane.b32.xlu0 %v2044_v57, %s2479_s29 }
 0x11b   : > { %1128 = vrot.lane.b32.xlu0 %v2052_v63, %s2480_s17  ;;  %v2969_v63 = vrot.slane %v1648_v58, 4 }
 0x11d   : > { %v2978_v6 = vsel %vm1650_vm12, %v2969_v63, %v1648_v58  ;;  %v1661_v17 = vmul.bf16 %v2969_v63, %v2842_v38 }
 0x11e   : > { %v1658_v12 = vmul.bf16 %v2978_v6, %v2846_v40  ;;  %v1660_v13 = vmul.bf16 %v2978_v6, %v2848_v41 }
 0x11f   : > { %1126 = vrot.lane.b32.xlu0 %v2051_v2, %s2480_s17 }
 0x123   : > { %1277 = vrot.lane.b32.xlu0 %v2064_v9, %s2481_s20 }
 0x127   : > { %1420 = vrot.lane.b32.xlu0 %v2074_v10, %s2482_s0 }
 0x12b   : > { %1418 = vrot.lane.b32.xlu0 %v2073_v11, %s2482_s0 }
 0x152   : > { %v2909_v14 = vpop.f32.mrf.mxu0 }
 0x154   : > { %v2911_v16 = vpop.f32.mrf.mxu0 }
 0x155   : > { %v2107_v19 = vpack.c.bf16 %v2911_v16, %v2909_v14 }
 0x156   : > { %v486_v20 = vpop.f32.mrf.mxu0 }
 0x157   : > { %493 = vst [vmem:[%s2916_s21 + $0x10] sm:$0xff] %v486_v20  ;;  %505 = vrot.lane.b32.xlu1 %v2107_v19, %s2469_s3 }
 0x158   : > { %v488_v7 = vpop.f32.mrf.mxu0 }
 0x159   : > { %494 = vst [vmem:[%s2916_s21 + $0x18] sm:$0xff] %v488_v7  ;;  %v2108_v22 = vpack.c.bf16 %v488_v7, %v486_v20 }
 0x15b   : > { %507 = vrot.lane.b32.xlu1 %v2108_v22, %s2469_s3  ;;  %s2484_s3 = smov 95   ;;  %v1659_v22 = vmul.bf16 %v2969_v63, %v2838_v37 }
 0x15f   : > { %1502 = vrot.lane.b32.xlu1 %v2077_v23, %s2483_s23  ;;  %s1804_s23 = scalar_lea.sflag [#allocation5], %s2705_s19 }
 0x163   : > { %709 = vrot.lane.b32.xlu1 %v2023_v25, %s2477_s30 }
 0x167   : > { %707 = vrot.lane.b32.xlu1 %v2022_v26, %s2477_s30 }
 0x16b   : > { %846 = vrot.lane.b32.xlu1 %v2033_v34, %s2478_s13  ;;  %v2095_v34 = vcombine.low %v1659_v22, %v1661_v17 }
 0x16f   : > { %989 = vrot.lane.b32.xlu1 %v2043_v35, %s2479_s29 }
 0x173   : > { %987 = vrot.lane.b32.xlu1 %v2042_v36, %s2479_s29 }
 0x177   : > { %1130 = vrot.lane.b32.xlu1 %v2053_v48, %s2480_s17 }
 0x17b   : > { %1275 = vrot.lane.b32.xlu1 %v2063_v50, %s2481_s20 }
 0x17d   : > { %v712_v20 = vpop.permute.xlu0 %711 }
 0x17f   : > { %1273 = vrot.lane.b32.xlu1 %v2062_v51, %s2481_s20 }
 0x181   : > { %v845_v27 = vpop.permute.xlu0 %844 }
 0x183   : > { %1422 = vrot.lane.b32.xlu1 %v2075_v55, %s2482_s0 }
 0x185   : > { %v843_v45 = vpop.permute.xlu0 %842 }
 0x186   : > { %v851_v51 = vsel %vm848_vm15, %v843_v45, %v845_v27 }
 0x1c9   : > { %v506_v56 = vpop.permute.xlu1 %505 }
 0x1ca   : > { %v509_v57 = vrot.slane %v506_v56, 4 }
 0x1cc   : > { %v512_v59 = vsel %vm511_vm5, %v509_v57, %v506_v56  ;;  %522 = vst.msk [vmem:[#allocation2 + $0x8] sm:$0xf] %vm379_vm1, %v509_v57 }
 0x1cd   : > { %521 = vst.msk [vmem:[#allocation2] sm:$0xff] %vm2822_vm6, %v512_v59  ;;  %v508_v60 = vpop.permute.xlu1 %507 }
 0x1ce   : > { %v510_v61 = vrot.slane %v508_v60, 4 }
 0x1d0   : > { %v513_v2 = vsel %vm511_vm5, %v510_v61, %v508_v60  ;;  %524 = vst.msk [vmem:[#allocation2 + $0x14] sm:$0xf] %vm379_vm1, %v510_v61  ;;  %vm1132_vm1 = vcmask 916480   ;;  %vm1708_vm5 = vcmask 769024  }
 0x1d1   : > { %523 = vst.msk [vmem:[#allocation2 + $0xc] sm:$0xff] %vm2822_vm6, %v513_v2  ;;  %v1503_v3 = vpop.permute.xlu1 %1502 }
 0x1d2   : > { %v2975_v4 = vrot.slane %v1503_v3, 4 }
 0x1d4   : > { %v2981_v8 = vsel %vm1505_vm13, %v2975_v4, %v1503_v3  ;;  %v1514_v9 = vmul.bf16 %v2975_v4, %v2838_v37  ;;  %v1516_v10 = vmul.bf16 %v2975_v4, %v2842_v38  ;;  %v2995_v15 = vld [vmem:[#allocation2] sm:$0xff]  ;;  %v3015_v37 = vld [vmem:[#allocation2 + $0x8] sm:$0xf] }
 0x1d5   : > { %v1513_v24 = vmul.bf16 %v2981_v8, %v2846_v40  ;;  %v1515_v11 = vmul.bf16 %v2981_v8, %v2848_v41  ;;  %v710_v28 = vpop.permute.xlu1 %709  ;;  %v592_v7 = vmul.bf16 %v2832_v33, %v2995_v15  ;;  %v2094_v41 = vcombine.high %v1658_v12, %v1660_v13 }
 0x1d6   : > { %v2084_v0 = vcombine.low %v1514_v9, %v1516_v10  ;;  %v717_v48 = vsel %vm713_vm14, %v710_v28, %v712_v20  ;;  %v940_v50 = vmul.bf16 %v2861_v47, %v3015_v37  ;;  %v795_v58 = vmul.bf16 %v2840_v18, %v3015_v37 }
 0x1d7   : > { %v2083_v19 = vcombine.high %v1513_v24, %v1515_v11  ;;  %v2082_v23 = vcombine.low %v1513_v24, %v1515_v11  ;;  %v3011_v35 = vld [vmem:[#allocation2 + $0x14] sm:$0xf]  ;;  %v1510_v3 = vmul.bf16 %v2975_v4, %v3015_v37  ;;  %v794_v11 = vmul.bf16 %v2851_v42, %v2995_v15 }
 0x1d8   : > { %v2997_v29 = vld [vmem:[#allocation2 + $0xc] sm:$0xff]  ;;  %1561 = vrot.lane.b32.xlu0 %v2084_v0, %s2484_s3  ;;  %v2021_v38 = vcombine.low %v3015_v37, %v3011_v35  ;;  %v942_v36 = vmul.bf16 %v2861_v47, %v3011_v35  ;;  %v1228_v55 = vmul.bf16 %v2886_v62, %v3011_v35  ;;  %v797_v57 = vmul.bf16 %v2840_v18, %v3011_v35 }
 0x1d9   : > { %1559 = vrot.lane.b32.xlu1 %v2083_v19, %s2484_s3  ;;  %v593_v40 = vmul.bf16 %v2832_v33, %v2997_v29  ;;  %v708_v30 = vpop.permute.xlu1 %707  ;;  %v2093_v33 = vcombine.low %v1658_v12, %v1660_v13  ;;  %v2020_v43 = vcombine.high %v2995_v15, %v2997_v29  ;;  %v2019_v56 = vcombine.low %v2995_v15, %v2997_v29 }
 0x1da   : > { %v716_v39 = vsel %vm713_vm14, %v708_v30, %v710_v28  ;;  %v2041_v54 = vcombine.low %v940_v50, %v942_v36  ;;  %v1226_v47 = vmul.bf16 %v2886_v62, %v3015_v37  ;;  %v1512_v60 = vmul.bf16 %v2975_v4, %v3011_v35 }
 0x1db   : > { %v2014_v25 = vcombine.high %v592_v7, %v593_v40  ;;  %v2013_v26 = vcombine.low %v592_v7, %v593_v40  ;;  %v2030_v61 = vcombine.low %v795_v58, %v797_v57  ;;  %v1081_v2 = vmul.bf16 %v2863_v49, %v3011_v35 }
 0x1dc   : > { %1704 = vrot.lane.b32.xlu0 %v2094_v41, %s2485_s26  ;;  %v2061_v59 = vcombine.low %v1226_v47, %v1228_v55  ;;  %v1079_v62 = vmul.bf16 %v2863_v49, %v3015_v37  ;;  %v2081_v9 = vcombine.low %v1510_v3, %v1512_v60  ;;  %v796_v18 = vmul.bf16 %v2851_v42, %v2997_v29 }
 0x1dd   : > { %1557 = vrot.lane.b32.xlu1 %v2082_v23, %s2484_s3  ;;  %641 = vmatprep.subr.bf16.mxu1 %v2014_v25  ;;  %v847_v46 = vpop.permute.xlu1 %846  ;;  %v1373_v24 = vmul.bf16 %v2888_v1, %v3011_v35  ;;  %v1371_v4 = vmul.bf16 %v2888_v1, %v3015_v37  ;;  %v941_v13 = vmul.bf16 %v2935_v31, %v2997_v29 }
 0x1de   : > { %642 = vmatpush1.bf16.msra.mxu1 %v2013_v26  ;;  %v852_v52 = vsel %vm848_vm15, %v845_v27, %v847_v46  ;;  %v2050_v10 = vcombine.low %v1079_v62, %v1081_v2  ;;  %v2029_v12 = vcombine.high %v794_v11, %v796_v18  ;;  %v939_v0 = vmul.bf16 %v2935_v31, %v2995_v15 }
 0x1df   : > { %737 = vmatprep.subr.bf16.mxu1 %v717_v48  ;;  %872 = vmatprep.subr.bf16.mxu0 %v852_v52  ;;  %v2072_v49 = vcombine.low %v1371_v4, %v1373_v24  ;;  %v2028_v19 = vcombine.low %v794_v11, %v796_v18  ;;  %v1080_v42 = vmul.bf16 %v2871_v53, %v2997_v29  ;;  %v2234_v18 = vld [vmem:[#allocation9 + $0x20] sm:$0xff]  }
 0x1e0   : > { %1702 = vrot.lane.b32.xlu0 %v2093_v33, %s2485_s26  ;;  %873 = vmatpush1.bf16.msra.mxu0 %v851_v51  ;;  %v2040_v20 = vcombine.high %v939_v0, %v941_v13  ;;  %v1078_v1 = vmul.bf16 %v2871_v53, %v2995_v15  ;;  %v2039_v7 = vcombine.low %v939_v0, %v941_v13 }
 0x1e1   : > { %1706 = vrot.lane.b32.xlu1 %v2095_v34, %s2485_s26  ;;  %2017 = vmatmul.mubr.msk.bf16.vlgmr.msra.gmra.mxu1 %vm623_vm9, %v2233_v32  ;;  %v1227_v40 = vmul.bf16 %v2950_v44, %v2997_v29  ;;  %v1225_v31 = vmul.bf16 %v2950_v44, %v2995_v15  ;;  %v1372_v22 = vmul.bf16 %v2897_v5, %v2997_v29 }
 0x1e2   : > { %757 = vmatprep.mubr.bf16.mxu1 %v2476_v21  ;;  %738 = vmatpush1.bf16.msra.mxu1 %v716_v39  ;;  %v2049_v28 = vcombine.high %v1078_v1, %v1080_v42  ;;  %v2048_v41 = vcombine.low %v1078_v1, %v1080_v42  ;;  %v1370_v53 = vmul.bf16 %v2897_v5, %v2995_v15  ;;  %v990_v39 = vpop.permute.xlu1 %989 }
 0x1e3   : > { %v2060_v23 = vcombine.high %v1225_v31, %v1227_v40  ;;  %v1511_v26 = vmul.bf16 %v2981_v8, %v2997_v29  ;;  %v2059_v17 = vcombine.low %v1225_v31, %v1227_v40  ;;  %v1509_v44 = vmul.bf16 %v2981_v8, %v2995_v15 }
 0x1e4   : > { %705 = vrot.lane.b32.xlu0 %v2021_v38, %s2477_s30  ;;  %v2071_v25 = vcombine.high %v1370_v53, %v1372_v22  ;;  %v2070_v27 = vcombine.low %v1370_v53, %v1372_v22  ;;  %v1656_v30 = vmul.bf16 %v2978_v6, %v2997_v29  ;;  %v1654_v5 = vmul.bf16 %v2978_v6, %v2995_v15  ;;  %v1768_v6 = vld [vmem:[%s3294_s4 + $0x8] sm:$0xff]  ;;  %v1767_v15 = vld [vmem:[%s3294_s4] sm:$0xff] }
 0x1e5   : > { %703 = vrot.lane.b32.xlu1 %v2020_v43, %s2477_s30  ;;  %v2080_v33 = vcombine.high %v1509_v44, %v1511_v26  ;;  %v2079_v34 = vcombine.low %v1509_v44, %v1511_v26  ;;  %v1657_v38 = vmul.bf16 %v2969_v63, %v3011_v35  ;;  %v1655_v8 = vmul.bf16 %v2969_v63, %v3015_v37  ;;  %v992_v35 = vpop.permute.xlu0 %991 }
 0x1e6   : > { %v2091_v32 = vcombine.high %v1654_v5, %v1656_v30  ;;  %v2090_v29 = vcombine.low %v1654_v5, %v1656_v30  ;;  %v988_v63 = vpop.permute.xlu1 %987  ;;  %v2237_v30 = vld [vmem:[#allocation9 + $0x18] sm:$0xff]  }
 0x1e7   : > { %v2092_v36 = vcombine.low %v1655_v8, %v1657_v38  ;;  %v996_v4 = vsel %vm993_vm0, %v988_v63, %v990_v39  ;;  %v2239_v63 = vld [vmem:[#allocation9 + $0x30] sm:$0xff]  }
 0x1e8   : > { %985 = vrot.lane.b32.xlu0 %v2041_v54, %s2479_s29 }
 0x1e9   : > { %701 = vrot.lane.b32.xlu1 %v2019_v56, %s2477_s30  ;;  %v1129_v43 = vpop.permute.xlu0 %1128  ;;  %s2111_s30 = sshll.u32 %s2550_s28, 9 }
 0x1ea   : > { %v1131_v45 = vpop.permute.xlu1 %1130 }
 0x1eb   : > { %v1136_v40 = vsel %vm1132_vm1, %v1129_v43, %v1131_v45 }
 0x1ec   : > { %1271 = vrot.lane.b32.xlu0 %v2061_v59, %s2481_s20 }
 0x1ed   : > { %840 = vrot.lane.b32.xlu1 %v2030_v61, %s2478_s13  ;;  %v1127_v37 = vpop.permute.xlu0 %1126 }
 0x1ee   : > { %v3115_v48 = vpop.permute.xlu1 %1275 }
 0x1f0   : > { %1555 = vrot.lane.b32.xlu0 %v2081_v9, %s2484_s3 }
 0x1f1   : > { %1124 = vrot.lane.b32.xlu1 %v2050_v10, %s2480_s17  ;;  %v1278_v46 = vpop.permute.xlu0 %1277  ;;  %v997_v10 = vsel %vm993_vm0, %v990_v39, %v992_v35 }
 0x1f2   : > { %v3119_v51 = vpop.permute.xlu1 %1273  ;;  %v1283_v26 = vsel %vm1279_vm2, %v3115_v48, %v1278_v46 }
 0x1f4   : > { %838 = vrot.lane.b32.xlu0 %v2029_v12, %s2478_s13 }
 0x1f5   : > { %1416 = vrot.lane.b32.xlu1 %v2072_v49, %s2482_s0  ;;  %v3117_v50 = vpop.permute.xlu0 %1420 }
 0x1f6   : > { %v3123_v54 = vpop.permute.xlu1 %1422 }
 0x1f7   : > { %v1428_v5 = vsel %vm1424_vm3, %v3117_v50, %v3123_v54  ;;  %v2240_v54 = vld [vmem:[#allocation9 + $0x38] sm:$0xff]  }
 0x1f8   : > { %836 = vrot.lane.b32.xlu0 %v2028_v19, %s2478_s13 }
 0x1f9   : > { %983 = vrot.lane.b32.xlu1 %v2040_v20, %s2479_s29  ;;  %v3121_v52 = vpop.permute.xlu0 %1418 }
 0x1fa   : > { %v1427_v38 = vsel %vm1424_vm3, %v3121_v52, %v3117_v50 }
 0x1fc   : > { %1122 = vrot.lane.b32.xlu0 %v2049_v28, %s2480_s17  ;;  %v2235_v28 = vld [vmem:[#allocation9 + $0x8] sm:$0xff]  }
 0x1fd   : > { %981 = vrot.lane.b32.xlu1 %v2039_v7, %s2479_s29  ;;  %s3210_s29 = scalar_lea.hbm %s3296_s6, %s2111_s30 }
 0x200   : > { %1120 = vrot.lane.b32.xlu0 %v2048_v41, %s2480_s17  ;;  %v1135_v41 = vsel %vm1132_vm1, %v1127_v37, %v1129_v43 }
 0x201   : > { %1269 = vrot.lane.b32.xlu1 %v2060_v23, %s2481_s20 }
 0x204   : > { %1414 = vrot.lane.b32.xlu0 %v2071_v25, %s2482_s0  ;;  %v2236_v25 = vld [vmem:[#allocation9 + $0x10] sm:$0xff]  }
 0x205   : > { %1267 = vrot.lane.b32.xlu1 %v2059_v17, %s2481_s20 }
 0x208   : > { %1412 = vrot.lane.b32.xlu0 %v2070_v27, %s2482_s0  ;;  %s3217_s0 = scalar_lea.hbm %s3297_s7, %s2111_s30 }
 0x209   : > { %1553 = vrot.lane.b32.xlu1 %v2080_v33, %s2484_s3  ;;  %v1282_v33 = vsel %vm1279_vm2, %v3119_v51, %v3115_v48 }
 0x20c   : > { %1698 = vrot.lane.b32.xlu0 %v2091_v32, %s2485_s26 }
 0x20d   : > { %1551 = vrot.lane.b32.xlu1 %v2079_v34, %s2484_s3  ;;  %s2350_s3 = scalar_lea.vmem %s3200_s11, 512 }
 0x20e   : > { %p2351_p0 = scmp.ne.s32.totalorder %s3200_s11, %s2350_s3 }
 0x210   : > { %1696 = vrot.lane.b32.xlu0 %v2090_v29, %s2485_s26  ;;  %p2352_p3 = pnand %p2351_p0, %p3329_p5 }
 0x211   : > { %1700 = vrot.lane.b32.xlu1 %v2092_v36, %s2485_s26  ;;  %s2486_s26 = smov [#allocation11]  }
 0x212   : > { %p2353_p11 = pneg %p2352_p3  ;;  %s2354_s14 = sshll.u32 %s2486_s26, 4  ;;  %s2355_s14 = int_to_ptr.vmem [resolvable:$false] %s2354_s14 }
 0x213   : > { %s2356_s16 = scalar_lea.vmem %s2355_s14, 1024  ;;  %p2357_p9 = scmp.lt.s32.totalorder %s3200_s11, %s2355_s14 }
 0x214   : > { %1776 = vperm.xlu0 %2216, %v1768_v6   ;;  %v2238_v6 = vld [vmem:[#allocation9 + $0x28] sm:$0xff]   ;;  %p2358_p13 = scmp.lt.s32.totalorder %s2356_s16, %s2350_s3 }
 0x215   : > { %1771 = vperm.xlu1 %2215, %v1767_v15  }
 0x216   : > { %p2359_p1 = por %p2358_p13, %p2357_p9 }
 0x218   : > { %p2360_p4 = pnand %p2359_p1, %p2353_p11 }
 0x24a   : > { %v3125_v55 = vpop.permute.xlu0 %1561 }
 0x24b   : > { %v3127_v56 = vpop.permute.xlu1 %1559 }
 0x24c   : > { %v1567_v15 = vsel %vm1563_vm4, %v3127_v56, %v3125_v55 }
 0x24e   : > { %v3129_v57 = vpop.permute.xlu0 %1704 }
 0x24f   : > { %v3131_v47 = vpop.permute.xlu1 %1557 }
 0x250   : > { %v1566_v37 = vsel %vm1563_vm4, %v3131_v47, %v3127_v56 }
 0x252   : > { %v3133_v58 = vpop.permute.xlu0 %1702 }
 0x253   : > { %v3135_v59 = vpop.permute.xlu1 %1706  ;;  %v1711_v50 = vsel %vm1708_vm5, %v3133_v58, %v3129_v57 }
 0x254   : > { %v1712_v45 = vsel %vm1708_vm5, %v3129_v57, %v3135_v59  ;;  %v2241_v57 = vld [vmem:[#allocation9 + $0x40] sm:$0xff]  }
 0x256   : > { %v706_v60 = vpop.permute.xlu0 %705 }
 0x257   : > { %v704_v61 = vpop.permute.xlu1 %703 }
 0x258   : > { %v715_v2 = vsel %vm713_vm14, %v704_v61, %v706_v60 }
 0x259   : > { %739 = vmatprep.subr.bf16.mxu1 %v715_v2 }
 0x25a   : > { %v986_v3 = vpop.permute.xlu0 %985 }
 0x25b   : > { %v702_v62 = vpop.permute.xlu1 %701 }
 0x25c   : > { %v714_v9 = vsel %vm713_vm14, %v702_v62, %v704_v61 }
 0x25d   : > { %740 = vmatpush1.bf16.msra.mxu1 %v714_v9 }
 0x25e   : > { %v1272_v24 = vpop.permute.xlu0 %1271  ;;  %1017 = vmatprep.subr.bf16.mxu1 %v997_v10 }
 0x25f   : > { %v841_v11 = vpop.permute.xlu1 %840 }
 0x260   : > { %2025 = vmatmul.mubr.msk.bf16.vlgmr.msra.gmra.mxu1 %vm623_vm9, %v2234_v18 }
 0x261   : > { %1018 = vmatpush1.bf16.msra.mxu1 %v996_v4  ;;  %1037 = vmatprep.mubr.bf16.mxu1 %v2476_v21 }
 0x262   : > { %v3143_v12 = vpop.permute.xlu0 %1555 }
 0x263   : > { %v1125_v49 = vpop.permute.xlu1 %1124 }
 0x266   : > { %v839_v13 = vpop.permute.xlu0 %838 }
 0x267   : > { %v1417_v0 = vpop.permute.xlu1 %1416  ;;  %v850_v19 = vsel %vm848_vm15, %v839_v13, %v841_v11 }
 0x268   : > { %874 = vmatprep.subr.bf16.mxu0 %v850_v19 }
 0x26a   : > { %v837_v42 = vpop.permute.xlu0 %836 }
 0x26b   : > { %v849_v20 = vsel %vm848_vm15, %v837_v42, %v839_v13  ;;  %v984_v1 = vpop.permute.xlu1 %983 }
 0x26c   : > { %875 = vmatpush1.bf16.msra.mxu0 %v849_v20  ;;  %v995_v7 = vsel %vm993_vm0, %v984_v1, %v986_v3 }
 0x26d   : > { %1019 = vmatprep.subr.bf16.mxu1 %v995_v7  ;;  %1156 = vmatprep.subr.bf16.mxu0 %v1136_v40 }
 0x26e   : > { %v1123_v31 = vpop.permute.xlu0 %1122 }
 0x26f   : > { %2034 = vmatmul.mubr.msk.bf16.vlgmr.msra.gmra.mxu0 %vm623_vm9, %v2235_v28  ;;  %v982_v22 = vpop.permute.xlu1 %981  ;;  %v1134_v23 = vsel %vm1132_vm1, %v1123_v31, %v1125_v49 }
 0x270   : > { %v994_v53 = vsel %vm993_vm0, %v982_v22, %v984_v1  ;;  %1157 = vmatpush1.bf16.msra.mxu0 %v1135_v41  ;;  %1176 = vmatprep.mubr.bf16.mxu0 %v2476_v21 }
 0x271   : > { %1020 = vmatpush1.bf16.msra.mxu1 %v994_v53  ;;  %1158 = vmatprep.subr.bf16.mxu0 %v1134_v23 }
 0x272   : > { %v1121_v17 = vpop.permute.xlu0 %1120  ;;  %1303 = vmatprep.subr.bf16.mxu1 %v1283_v26 }
 0x273   : > { %v1133_v44 = vsel %vm1132_vm1, %v1121_v17, %v1123_v31  ;;  %v1270_v27 = vpop.permute.xlu1 %1269 }
 0x274   : > { %2045 = vmatmul.mubr.msk.bf16.vlgmr.msra.gmra.mxu1 %vm623_vm9, %v2236_v25  ;;  %1159 = vmatpush1.bf16.msra.mxu0 %v1133_v44  ;;  %v1281_v32 = vsel %vm1279_vm2, %v1270_v27, %v1272_v24 }
 0x275   : > { %1304 = vmatpush1.bf16.msra.mxu1 %v1282_v33  ;;  %1448 = vmatprep.subr.bf16.mxu0 %v1428_v5 }
 0x276   : > { %v1415_v34 = vpop.permute.xlu0 %1414  ;;  %1305 = vmatprep.subr.bf16.mxu1 %v1281_v32  ;;  %1323 = vmatprep.mubr.bf16.mxu1 %v2476_v21 }
 0x277   : > { %2054 = vmatmul.mubr.msk.bf16.vlgmr.msra.gmra.mxu0 %vm623_vm9, %v2237_v30  ;;  %v1268_v8 = vpop.permute.xlu1 %1267  ;;  %v1426_v29 = vsel %vm1424_vm3, %v1415_v34, %v1417_v0 }
 0x278   : > { %v1280_v36 = vsel %vm1279_vm2, %v1268_v8, %v1270_v27  ;;  %1449 = vmatpush1.bf16.msra.mxu0 %v1427_v38  ;;  %1468 = vmatprep.mubr.bf16.mxu0 %v2476_v21 }
 0x279   : > { %1306 = vmatpush1.bf16.msra.mxu1 %v1280_v36  ;;  %1450 = vmatprep.subr.bf16.mxu0 %v1426_v29 }
 0x27a   : > { %v1413_v35 = vpop.permute.xlu0 %1412  ;;  %1587 = vmatprep.subr.bf16.mxu1 %v1567_v15 }
 0x27b   : > { %v1425_v39 = vsel %vm1424_vm3, %v1413_v35, %v1415_v34  ;;  %v1554_v43 = vpop.permute.xlu1 %1553 }
 0x27c   : > { %2065 = vmatmul.mubr.msk.bf16.vlgmr.msra.gmra.mxu1 %vm623_vm9, %v2238_v6  ;;  %1451 = vmatpush1.bf16.msra.mxu0 %v1425_v39  ;;  %v1565_v46 = vsel %vm1563_vm4, %v1554_v43, %v3143_v12 }
 0x27d   : > { %1588 = vmatpush1.bf16.msra.mxu1 %v1566_v37  ;;  %1732 = vmatprep.subr.bf16.mxu0 %v1712_v45 }
 0x27e   : > { %v1699_v48 = vpop.permute.xlu0 %1698  ;;  %1589 = vmatprep.subr.bf16.mxu1 %v1565_v46  ;;  %1607 = vmatprep.mubr.bf16.mxu1 %v2476_v21 }
 0x27f   : > { %2076 = vmatmul.mubr.msk.bf16.vlgmr.msra.gmra.mxu0 %vm623_vm9, %v2239_v63  ;;  %v1552_v51 = vpop.permute.xlu1 %1551 }
 0x280   : > { %v1564_v52 = vsel %vm1563_vm4, %v1552_v51, %v1554_v43  ;;  %1733 = vmatpush1.bf16.msra.mxu0 %v1711_v50  ;;  %1752 = vmatprep.mubr.bf16.mxu0 %v2476_v21 }
 0x281   : > { %1590 = vmatpush1.bf16.msra.mxu1 %v1564_v52 }
 0x282   : > { %v1697_v55 = vpop.permute.xlu0 %1696 }
 0x283   : > { %v1701_v56 = vpop.permute.xlu1 %1700  ;;  %v1709_v59 = vsel %vm1708_vm5, %v1697_v55, %v1699_v48 }
 0x284   : > { %2085 = vmatmul.mubr.msk.bf16.vlgmr.msra.gmra.mxu1 %vm623_vm9, %v2240_v54  ;;  %v1710_v47 = vsel %vm1708_vm5, %v1699_v48, %v1701_v56 }
 0x285   : > { %1734 = vmatprep.subr.bf16.mxu0 %v1710_v47 }
 0x286   : > { %1735 = vmatpush1.bf16.msra.mxu0 %v1709_v59 }
 0x289   : > { %2096 = vmatmul.mubr.msk.bf16.vlgmr.msra.gmra.mxu0 %vm623_vm9, %v2241_v57 }
 0x290   : > { %v1772_v52 = vpop.permute.xlu1 %1771 }
 0x2a1   : > { %v661_v58 = vpop.f32.mrf.mxu1 }
 0x2a3   : > { %v663_v60 = vpop.f32.mrf.mxu1 }
 0x2a5   : > { %v665_v61 = vpop.f32.mrf.mxu1 }
 0x2a7   : > { %v667_v2 = vpop.f32.mrf.mxu1 }
 0x320   : > { %v759_v3 = vpop.f32.mrf.mxu1 }
 0x321   : > { %v760_v13 = vadd.f32 %v759_v3, %v661_v58  ;;  %v1777_v3 = vpop.permute.xlu0 %1776 }
 0x322   : > { %v761_v21 = vpop.f32.mrf.mxu1 }
 0x323   : > { %v762_v42 = vadd.f32 %v761_v21, %v663_v60 }
 0x324   : > { %v763_v62 = vpop.f32.mrf.mxu1 }
 0x325   : > { %v764_v7 = vadd.f32 %v763_v62, %v665_v61 }
 0x326   : > { %v765_v10 = vpop.f32.mrf.mxu1 }
 0x327   : > { %v766_v23 = vadd.f32 %v765_v10, %v667_v2 }
 0x32f   : > { %v894_v9 = vpop.f32.mrf.mxu0 }
 0x330   : > { %v903_v20 = vadd.f32 %v894_v9, %v760_v13 }
 0x331   : > { %v896_v18 = vpop.f32.mrf.mxu0 }
 0x332   : > { %v904_v40 = vadd.f32 %v896_v18, %v762_v42 }
 0x333   : > { %v898_v24 = vpop.f32.mrf.mxu0 }
 0x334   : > { %v1039_v11 = vpop.f32.mrf.mxu1  ;;  %v905_v53 = vadd.f32 %v898_v24, %v764_v7 }
 0x335   : > { %v900_v4 = vpop.f32.mrf.mxu0  ;;  %v1048_v31 = vadd.f32 %v1039_v11, %v903_v20 }
 0x336   : > { %v1041_v12 = vpop.f32.mrf.mxu1  ;;  %v906_v44 = vadd.f32 %v900_v4, %v766_v23 }
 0x337   : > { %v1178_v49 = vpop.f32.mrf.mxu0  ;;  %v1049_v25 = vadd.f32 %v1041_v12, %v904_v40 }
 0x338   : > { %v1043_v0 = vpop.f32.mrf.mxu1  ;;  %v1187_v27 = vadd.f32 %v1178_v49, %v1048_v31 }
 0x339   : > { %v1180_v19 = vpop.f32.mrf.mxu0  ;;  %v1050_v30 = vadd.f32 %v1043_v0, %v905_v53 }
 0x33a   : > { %v1045_v1 = vpop.f32.mrf.mxu1  ;;  %v1188_v32 = vadd.f32 %v1180_v19, %v1049_v25  ;;  %v1793_v19 = vld [vmem:[%s2916_s21 + $0x10] sm:$0xff] }
 0x33b   : > { %v1182_v28 = vpop.f32.mrf.mxu0  ;;  %v1051_v34 = vadd.f32 %v1045_v1, %v906_v44 }
 0x33c   : > { %v1325_v41 = vpop.f32.mrf.mxu1  ;;  %v1189_v36 = vadd.f32 %v1182_v28, %v1050_v30 }
 0x33d   : > { %v1184_v22 = vpop.f32.mrf.mxu0  ;;  %v1334_v38 = vadd.f32 %v1325_v41, %v1187_v27 }
 0x33e   : > { %v1327_v26 = vpop.f32.mrf.mxu1  ;;  %v1190_v35 = vadd.f32 %v1184_v22, %v1051_v34 }
 0x33f   : > { %v1470_v17 = vpop.f32.mrf.mxu0  ;;  %v1335_v6 = vadd.f32 %v1327_v26, %v1188_v32 }
 0x340   : > { %v1329_v33 = vpop.f32.mrf.mxu1  ;;  %v1479_v39 = vadd.f32 %v1470_v17, %v1334_v38 }
 0x341   : > { %v1472_v5 = vpop.f32.mrf.mxu0  ;;  %v1336_v43 = vadd.f32 %v1329_v33, %v1189_v36 }
 0x342   : > { %v1331_v8 = vpop.f32.mrf.mxu1  ;;  %v1480_v45 = vadd.f32 %v1472_v5, %v1335_v6 }
 0x343   : > { %v1474_v29 = vpop.f32.mrf.mxu0  ;;  %v1337_v46 = vadd.f32 %v1331_v8, %v1190_v35 }
 0x344   : > { %v1609_v15 = vpop.f32.mrf.mxu1  ;;  %v1481_v54 = vadd.f32 %v1474_v29, %v1336_v43 }
 0x345   : > { %v1476_v37 = vpop.f32.mrf.mxu0  ;;  %v1618_v48 = vadd.f32 %v1609_v15, %v1479_v39 }
 0x346   : > { %v1611_v63 = vpop.f32.mrf.mxu1  ;;  %v1482_v57 = vadd.f32 %v1476_v37, %v1337_v46 }
 0x347   : > { %v1619_v55 = vadd.f32 %v1611_v63, %v1480_v45 }
 0x348   : > { %v1613_v50 = vpop.f32.mrf.mxu1 }
 0x349   : > { %v1754_v51 = vpop.f32.mrf.mxu0  ;;  %v1620_v58 = vadd.f32 %v1613_v50, %v1481_v54 }
 0x34a   : > { %v1763_v56 = vadd.f32 %v1754_v51, %v1618_v48  ;;  %v1615_v47 = vpop.f32.mrf.mxu1 }
 0x34b   : > { %v1756_v59 = vpop.f32.mrf.mxu0  ;;  %v1621_v21 = vadd.f32 %v1615_v47, %v1482_v57 }
 0x34c   : > { %v1764_v60 = vadd.f32 %v1756_v59, %v1619_v55  ;;  %v1779_v61 = vadd.f32 %v1772_v52, %v1763_v56 }
 0x34d   : > { %v1758_v2 = vpop.f32.mrf.mxu0 }
 0x34e   : > { %v1780_v62 = vadd.f32 %v1772_v52, %v1764_v60  ;;  %v1783_v9 = vmax.f32 %v1779_v61, 0.0  ;;  %v1765_v18 = vadd.f32 %v1758_v2, %v1620_v58 }
 0x34f   : > { %v1760_v10 = vpop.f32.mrf.mxu0 }
 0x350   : > { %v1784_v24 = vmax.f32 %v1780_v62, 0.0  ;;  %1787 = vst [vmem:[%s369_s15] sm:$0xff] %v1783_v9  ;;  %v1795_v11 = vsub.f32 %v2909_v14, %v1783_v9  ;;  %v1781_v4 = vadd.f32 %v1777_v3, %v1765_v18  ;;  %v1766_v12 = vadd.f32 %v1760_v10, %v1621_v21 }
 0x352   : > { %1788 = vst [vmem:[%s369_s15 + $0x8] sm:$0xff] %v1784_v24  ;;  %v1796_v49 = vsub.f32 %v2911_v16, %v1784_v24  ;;  %1799 = vst [vmem:[%s2916_s21] sm:$0xff] %v1795_v11  ;;  %v1785_v13 = vmax.f32 %v1781_v4, 0.0  ;;  %v1782_v0 = vadd.f32 %v1777_v3, %v1766_v12  ;;  %v1794_v16 = vld [vmem:[%s2916_s21 + $0x18] sm:$0xff] }
 0x354   : > { %1800 = vst [vmem:[%s2916_s21 + $0x8] sm:$0xff] %v1796_v49  ;;  %1789 = vst [vmem:[%s369_s15 + $0x10] sm:$0xff] %v1785_v13  ;;  %v1797_v14 = vsub.f32 %v1793_v19, %v1785_v13  ;;  %v1786_v42 = vmax.f32 %v1782_v0, 0.0 }
 0x356   : > { %1801 = vst [vmem:[%s2916_s21 + $0x10] sm:$0xff] %v1797_v14  ;;  %1790 = vst [vmem:[%s369_s15 + $0x18] sm:$0xff] %v1786_v42  ;;  %v1798_v20 = vsub.f32 %v1794_v16, %v1786_v42 }
 0x357   : > { %2363 = shalt.err (!%p2360_p4)
}
 0x358   : > { %s2364_s12 = scalar_lea.hbm %s3210_s29, 512  ;;  %s2368_s30 = scalar_lea.hbm %s3296_s6, 1024 }
 0x359   : > { %p2365_p10 = scmp.ne.s32.totalorder %s3210_s29, %s2364_s12  ;;  %p2369_p2 = scmp.lt.s32.totalorder %s3210_s29, %s3296_s6 }
 0x35a   : > { %p2370_p6 = scmp.lt.s32.totalorder %s2368_s30, %s2364_s12 }
 0x35b   : > { %p2366_p7 = pnand %p2365_p10, %p3329_p5 }
 0x35c   : > { %p2371_p12 = por %p2370_p6, %p2369_p2 }
 0x35d   : > { %p2367_p8 = pneg %p2366_p7 }
 0x35f   : > { %p2372_p0 = pnand %p2371_p12, %p2367_p8 }
 0x361   : > { %2375 = shalt.err (!%p2372_p0)
}
 0x362   : > { %s2487_s17 = smov 256   ;;  %1802 = vst [vmem:[%s2916_s21 + $0x18] sm:$0xff] %v1798_v20  ;;  %s1809_s20 = scalar_lea.sflag [#allocation13], %s2705_s19 }
 0x363   : > { %2125 = dma.vmem_to_hbm [thread:$0]  (%p3329_p5), %s3200_s11, 512, %s3210_s29, %s1804_s23, %s2487_s17, %s2487_s17, %s2473_s22  }
 0x364   : > { %s2376_s3 = scalar_lea.vmem %s3219_s9, 512  ;;  %s2488_s26 = smov [#allocation12]  }
 0x365   : > { %p2377_p3 = scmp.ne.s32.totalorder %s3219_s9, %s2376_s3  ;;  %s2380_s14 = sshll.u32 %s2488_s26, 4  ;;  %s2381_s14 = int_to_ptr.vmem [resolvable:$false] %s2380_s14 }
 0x366   : > { %s2382_s16 = scalar_lea.vmem %s2381_s14, 1024  ;;  %p2383_p13 = scmp.lt.s32.totalorder %s3219_s9, %s2381_s14 }
 0x367   : > { %p2378_p11 = pnand %p2377_p3, %p3329_p5  ;;  %p2384_p1 = scmp.lt.s32.totalorder %s2382_s16, %s2376_s3 }
 0x369   : > { %p2379_p9 = pneg %p2378_p11  ;;  %p2385_p4 = por %p2384_p1, %p2383_p13 }
 0x36b   : > { %p2386_p10 = pnand %p2385_p4, %p2379_p9 }
 0x36d   : > { %2389 = shalt.err (!%p2386_p10)
}
 0x36e   : > { %s2390_s21 = scalar_lea.hbm %s3217_s0, 512  ;;  %s2394_s29 = scalar_lea.hbm %s3297_s7, 1024 }
 0x36f   : > { %p2391_p7 = scmp.ne.s32.totalorder %s3217_s0, %s2390_s21  ;;  %p2395_p6 = scmp.lt.s32.totalorder %s3217_s0, %s3297_s7 }
 0x370   : > { %p2396_p12 = scmp.lt.s32.totalorder %s2394_s29, %s2390_s21 }
 0x371   : > { %p2392_p8 = pnand %p2391_p7, %p3329_p5 }
 0x372   : > { %p2397_p0 = por %p2396_p12, %p2395_p6 }
 0x373   : > { %p2393_p2 = pneg %p2392_p8 }
 0x375   : > { %p2398_p3 = pnand %p2397_p0, %p2393_p2 }
 0x377   : > { %2401 = shalt.err (!%p2398_p3)
}
 0x378   : > { %2126 = dma.vmem_to_hbm [thread:$0]  (%p3329_p5), %s3219_s9, 512, %s3217_s0, %s1809_s20, %s2487_s17, %s2487_s17, %s2473_s22  }
 0x379 PF: > { %s1853_s2 = sand.u32 1, %s2444_s24   ;;  %p3330_p11 = scmp.ne.s32.totalorder %s3309_s8, 0 }
 0x37a   : > { %p3331_p9 = scmp.ge.s32.totalorder %s2456_s27, 2  ;;  %s1854_s15 = scalar_lea.sflag [#allocation5], %s1853_s2 }
 0x37c   : > { %p2144_p13 = pnand %p3331_p9, %p3330_p11 }
 0x37e   : > { %p2145_p1 = pneg %p2144_p13 }
 0x380   : > { %2435 = dma.done.wait (%p2145_p1), %s1854_s15, 512  }
 0x381   : > { %2437 = vsyncadd (%p2145_p1), %s1854_s15, 4294966784  ;;  %s1863_s30 = scalar_lea.sflag [#allocation13], %s1853_s2 }
 0x382   : > { %2439 = dma.done.wait (%p2145_p1), %s1863_s30, 512  }
 0x383   : > { %2441 = vsyncadd (%p2145_p1), %s1863_s30, 4294966784  ;;  %s3332_s18 = sld [smem:[#allocation20_spill]]  ;;  %p28_p5 = scmp.ge.s32.totalorder %s2604_s10, 4  }
 0x384   : > { %s3333_s26 = sld [smem:[#allocation21_spill]]  ;;  %s3334_s24 = smov %s2448_s25 }
 0x385   : > { %s3336_s27 = smov %s2604_s10  ;;  %30 = sbr.rel (!%p28_p5) target bundleno = 14 (0xe), region = 135 }
 0x389   : > { %s3335_s25 = smov %s3332_s18 }
 0x38a   :  { %1868 = vsyncpa [#allocation4], 1 }
 0x38b   :  { %1870 = vsyncpa [#allocation4 + $0x1], 1 }
 0x38c   :  { %1871 = vsyncpa [#allocation7], 1 }
 0x38d   :  { %1873 = vsyncpa [#allocation7 + $0x1], 1 }
 0x38e   :  { %1874 = vsyncpa [#allocation10], 1 }
 0x38f   :  { %1875 = vsyncpa [#allocation5], 1 }
 0x390   :  { %1877 = vsyncpa [#allocation5 + $0x1], 1 }
 0x391   :  { %1878 = vsyncpa [#allocation13], 1 }
 0x392   :  { %1880 = vsyncpa [#allocation13 + $0x1], 1 }

</bundles_post_ra>
